<compile_context>
chip_gen: v7x
topology: tpu7x:2x2x1
jax: 0.10.0
libtpu: 0.0.40
codegen_flags: <defaults>
</compile_context>

<pallas_src>
import math

import jax
import jax.numpy as jnp
import numpy as np
from jax.experimental import pallas as pl
from jax.experimental.pallas import tpu as pltpu

# ----------------------------- config (small, synthetic) -----------------------------
B = 2            # batch
S = 8            # sequence length
H = 32           # hidden_size
NH = 4           # num_attention_heads
HD = H // NH     # attention_head_size
I = 64           # intermediate_size
EPS = 1e-12      # layer_norm_eps


def _layernorm(x, gamma, beta, eps):
    mu = jnp.mean(x, axis=-1, keepdims=True)
    var = jnp.mean((x - mu) ** 2, axis=-1, keepdims=True)
    return (x - mu) * jax.lax.rsqrt(var + eps) * gamma + beta


def _gelu_exact(x):
    # TAPE's gelu: x * 0.5 * (1 + erf(x / sqrt(2)))
    return x * 0.5 * (1.0 + jax.lax.erf(x / jnp.sqrt(2.0).astype(x.dtype)))


def bert_layer_kernel(
    x_ref, mask_ref,
    wq_ref, bq_ref, wk_ref, bk_ref, wv_ref, bv_ref,
    wao_ref, bao_ref, g1_ref, be1_ref,
    wi_ref, bi_ref, wo_ref, bo_ref, g2_ref, be2_ref,
    out_ref,
):
    BS, Hh = x_ref.shape            # (B*S, H)
    Bb, Ss = mask_ref.shape         # (B, S)
    nh, _, hd = wq_ref.shape        # (NH, H, HD)
    scale = 1.0 / math.sqrt(hd)

    x = x_ref[...]                  # (BS, H) f32 (kept f32 for residual / LN)
    x_bf = x.astype(jnp.bfloat16)   # bf16 operand for the MXU
    mask = mask_ref[...]            # (B, S) additive mask over key positions

    # --- self-attention, heads accumulated directly into the Wao projection ---
    ctx_proj = jnp.zeros((BS, Hh), jnp.float32)
    for h in range(nh):             # static unrolled per-head loop
        q_h = (jnp.dot(x_bf, wq_ref[h], preferred_element_type=jnp.float32)
               + bq_ref[h]).astype(jnp.bfloat16)          # (BS, HD)
        k_h = (jnp.dot(x_bf, wk_ref[h], preferred_element_type=jnp.float32)
               + bk_ref[h]).astype(jnp.bfloat16)
        v_h = (jnp.dot(x_bf, wv_ref[h], preferred_element_type=jnp.float32)
               + bv_ref[h]).astype(jnp.bfloat16)

        ctx_rows = []
        for b in range(Bb):         # static unrolled per-batch loop (sublane-aligned row slices)
            qb = q_h[b * Ss:(b + 1) * Ss, :]
            kb = k_h[b * Ss:(b + 1) * Ss, :]
            vb = v_h[b * Ss:(b + 1) * Ss, :]
            # scores = qb @ kb^T (contract the head dim of both operands; no transpose op)
            s = jax.lax.dot_general(qb, kb, (((1,), (1,)), ((), ())),
                                    preferred_element_type=jnp.float32) * scale
            s = s + mask[b:b + 1, :]                      # broadcast over query dim
            s = s - jnp.max(s, axis=-1, keepdims=True)
            p = jnp.exp(s)
            p = p * pl.reciprocal(jnp.sum(p, axis=-1, keepdims=True), approx=True)
            ctx_rows.append(jnp.dot(p.astype(jnp.bfloat16), vb,
                                    preferred_element_type=jnp.float32))
        ctx_h = jnp.concatenate(ctx_rows, axis=0)         # (BS, HD) sublane concat (cheap)
        # accumulate this head's contribution to the attention-output dense
        ctx_proj = ctx_proj + jnp.dot(ctx_h.astype(jnp.bfloat16), wao_ref[h],
                                      preferred_element_type=jnp.float32)

    # --- attention output: dense bias + residual + LayerNorm (f32) ---
    attn_out = ctx_proj + bao_ref[...]
    ln1 = _layernorm(attn_out + x, g1_ref[...], be1_ref[...], EPS)

    # --- intermediate: dense + exact-erf GELU ---
    inter = jnp.dot(ln1.astype(jnp.bfloat16), wi_ref[...],
                    preferred_element_type=jnp.float32) + bi_ref[...]
    inter = _gelu_exact(inter)

    # --- output: dense + residual + LayerNorm ---
    out = jnp.dot(inter.astype(jnp.bfloat16), wo_ref[...],
                  preferred_element_type=jnp.float32) + bo_ref[...]
    ln2 = _layernorm(out + ln1, g2_ref[...], be2_ref[...], EPS)

    out_ref[...] = ln2.astype(out_ref.dtype)


def protein_bert_layer(hidden_states, attention_mask, params):
    """hidden_states: (B,S,H) f32; attention_mask: (B,1,1,S) additive f32."""
    Bb, Ss, Hh = hidden_states.shape
    BS = Bb * Ss
    nh = NH
    hd = Hh // nh
    (wq, bq, wk, bk, wv, bv, wao, bao, g1, be1, wi, bi, wo, bo, g2, be2) = params

    # Fold batch into the row dimension (wrapper-side reshape).
    x2 = hidden_states.reshape(BS, Hh).astype(jnp.float32)
    mask2 = attention_mask.reshape(Bb, Ss).astype(jnp.float32)

    # Pre-slice projection weights per head (avoids non-128-aligned lane slicing
    # of activations inside the kernel); cast matmul weights to bf16.
    wq_h = jnp.transpose(wq.reshape(Hh, nh, hd), (1, 0, 2)).astype(jnp.bfloat16)  # (NH, H, HD)
    wk_h = jnp.transpose(wk.reshape(Hh, nh, hd), (1, 0, 2)).astype(jnp.bfloat16)
    wv_h = jnp.transpose(wv.reshape(Hh, nh, hd), (1, 0, 2)).astype(jnp.bfloat16)
    bq_h = bq.reshape(nh, 1, hd)
    bk_h = bk.reshape(nh, 1, hd)
    bv_h = bv.reshape(nh, 1, hd)
    wao_h = wao.reshape(nh, hd, Hh).astype(jnp.bfloat16)                          # (NH, HD, H)
    wi_b = wi.astype(jnp.bfloat16)
    wo_b = wo.astype(jnp.bfloat16)

    def full_spec(*shape):
        n = len(shape)
        return pl.BlockSpec(shape, lambda i, n=n: (0,) * n)

    in_specs = [
        full_spec(BS, Hh),                          # hidden_states (folded)
        full_spec(Bb, Ss),                          # additive attention mask
        full_spec(nh, Hh, hd), full_spec(nh, 1, hd),  # Wq (per head), bq
        full_spec(nh, Hh, hd), full_spec(nh, 1, hd),  # Wk, bk
        full_spec(nh, Hh, hd), full_spec(nh, 1, hd),  # Wv, bv
        full_spec(nh, hd, Hh), full_spec(1, Hh),      # W attn-out (per head), b
        full_spec(1, Hh), full_spec(1, Hh),           # gamma1, beta1
        full_spec(Hh, I), full_spec(1, I),            # W intermediate, b
        full_spec(I, Hh), full_spec(1, Hh),           # W output, b
        full_spec(1, Hh), full_spec(1, Hh),           # gamma2, beta2
    ]

    out = pl.pallas_call(
        bert_layer_kernel,
        out_shape=jax.ShapeDtypeStruct((BS, Hh), jnp.float32),
        grid_spec=pltpu.PrefetchScalarGridSpec(
            num_scalar_prefetch=0,
            grid=(1,),                       # single pipeline step: whole layer at once
            in_specs=in_specs,
            out_specs=full_spec(BS, Hh),
        ),
        compiler_params=pltpu.CompilerParams(
            dimension_semantics=("parallel",),
            vmem_limit_bytes=32 * 1024 * 1024),
    )(x2, mask2, wq_h, bq_h, wk_h, bk_h, wv_h, bv_h,
      wao_h, bao, g1, be1, wi_b, bi, wo_b, bo, g2, be2)
    return out.reshape(Bb, Ss, Hh)


def reference_layer(x, attention_mask, params):
    (wq, bq, wk, bk, wv, bv, wao, bao, g1, be1, wi, bi, wo, bo, g2, be2) = params
    q = x @ wq + bq[0]
    k = x @ wk + bk[0]
    v = x @ wv + bv[0]

    def split(t):  # (B,S,H) -> (B,NH,S,HD)
        return t.reshape(B, S, NH, HD).transpose(0, 2, 1, 3)

    qh, kh, vh = split(q), split(k), split(v)
    scores = jnp.einsum("bnqd,bnkd->bnqk", qh, kh) / math.sqrt(HD)
    scores = scores + attention_mask  # (B,1,1,S) broadcast
    probs = jax.nn.softmax(scores, axis=-1)
    ctx = jnp.einsum("bnqk,bnkd->bnqd", probs, vh)
    ctx = ctx.transpose(0, 2, 1, 3).reshape(B, S, H)

    attn_out = ctx @ wao + bao[0]
    ln1 = _layernorm(attn_out + x, g1[0], be1[0], EPS)
    inter = _gelu_exact(ln1 @ wi + bi[0])
    out = inter @ wo + bo[0]
    return _layernorm(out + ln1, g2[0], be2[0], EPS)


def init_params(key):
    ks = jax.random.split(key, 16)
    std = 0.02
    wq = jax.random.normal(ks[0], (H, H), jnp.float32) * std
    bq = jax.random.normal(ks[1], (1, H), jnp.float32) * 0.01
    wk = jax.random.normal(ks[2], (H, H), jnp.float32) * std
    bk = jax.random.normal(ks[3], (1, H), jnp.float32) * 0.01
    wv = jax.random.normal(ks[4], (H, H), jnp.float32) * std
    bv = jax.random.normal(ks[5], (1, H), jnp.float32) * 0.01
    wao = jax.random.normal(ks[6], (H, H), jnp.float32) * std
    bao = jax.random.normal(ks[7], (1, H), jnp.float32) * 0.01
    g1 = 1.0 + 0.01 * jax.random.normal(ks[8], (1, H), jnp.float32)
    be1 = 0.01 * jax.random.normal(ks[9], (1, H), jnp.float32)
    wi = jax.random.normal(ks[10], (H, I), jnp.float32) * std
    bi = jax.random.normal(ks[11], (1, I), jnp.float32) * 0.01
    wo = jax.random.normal(ks[12], (I, H), jnp.float32) * std
    bo = jax.random.normal(ks[13], (1, H), jnp.float32) * 0.01
    g2 = 1.0 + 0.01 * jax.random.normal(ks[14], (1, H), jnp.float32)
    be2 = 0.01 * jax.random.normal(ks[15], (1, H), jnp.float32)
    return (wq, bq, wk, bk, wv, bv, wao, bao, g1, be1, wi, bi, wo, bo, g2, be2)


if __name__ == "__main__":
    key = jax.random.PRNGKey(0)
    kx, kp = jax.random.split(key)

    x = jax.random.normal(kx, (B, S, H), jnp.float32)

    # BERT-style additive attention mask: keep all positions except the last 2
    # of batch element 1.
    keep = np.ones((B, S), dtype=np.float32)
    keep[1, -2:] = 0.0
    attention_mask = jnp.asarray((1.0 - keep) * -10000.0).reshape(B, 1, 1, S)

    params = init_params(kp)

    out = protein_bert_layer(x, attention_mask, params)
    out = jax.block_until_ready(out)

    ref = reference_layer(x, attention_mask, params)
    assert out.shape == (B, S, H)
    # bf16 matmul operands + approximate softmax reciprocal loosen numerics a bit
    # (review suggested ~1e-2); measured error is ~1e-3, 2e-2 gives comfortable margin.
    np.testing.assert_allclose(np.asarray(out), np.asarray(ref), atol=2e-2, rtol=2e-2)

    print("KERNEL_OK")
</pallas_src>

<mosaic_0001>
module attributes {stable_mosaic.version = 11 : i64} {
  func.func @bert_layer_kernel(%arg0: i32, %arg1: memref<16x32xf32, #tpu.memory_space<vmem>>, %arg2: memref<2x8xf32, #tpu.memory_space<vmem>>, %arg3: memref<4x32x8xbf16, #tpu.memory_space<vmem>>, %arg4: memref<4x1x8xf32, #tpu.memory_space<vmem>>, %arg5: memref<4x32x8xbf16, #tpu.memory_space<vmem>>, %arg6: memref<4x1x8xf32, #tpu.memory_space<vmem>>, %arg7: memref<4x32x8xbf16, #tpu.memory_space<vmem>>, %arg8: memref<4x1x8xf32, #tpu.memory_space<vmem>>, %arg9: memref<4x8x32xbf16, #tpu.memory_space<vmem>>, %arg10: memref<1x32xf32, #tpu.memory_space<vmem>>, %arg11: memref<1x32xf32, #tpu.memory_space<vmem>>, %arg12: memref<1x32xf32, #tpu.memory_space<vmem>>, %arg13: memref<32x64xbf16, #tpu.memory_space<vmem>>, %arg14: memref<1x64xf32, #tpu.memory_space<vmem>>, %arg15: memref<64x32xbf16, #tpu.memory_space<vmem>>, %arg16: memref<1x32xf32, #tpu.memory_space<vmem>>, %arg17: memref<1x32xf32, #tpu.memory_space<vmem>>, %arg18: memref<1x32xf32, #tpu.memory_space<vmem>>, %arg19: memref<16x32xf32, #tpu.memory_space<vmem>>) attributes {dimension_semantics = [#tpu.dimension_semantics<parallel>], iteration_bounds = array<i64: 1>, scalar_prefetch = 0 : i64, scratch_operands = 0 : i64, tpu.core_type = #tpu.core_type<tc>, window_params = [{pipeline_mode = #tpu.pipeline_mode<synchronous>, transform_indices = @transform_0, window_bounds = array<i64: 16, 32>}, {pipeline_mode = #tpu.pipeline_mode<synchronous>, transform_indices = @transform_1, window_bounds = array<i64: 2, 8>}, {pipeline_mode = #tpu.pipeline_mode<synchronous>, transform_indices = @transform_2, window_bounds = array<i64: 4, 32, 8>}, {pipeline_mode = #tpu.pipeline_mode<synchronous>, transform_indices = @transform_3, window_bounds = array<i64: 4, 1, 8>}, {pipeline_mode = #tpu.pipeline_mode<synchronous>, transform_indices = @transform_4, window_bounds = array<i64: 4, 32, 8>}, {pipeline_mode = #tpu.pipeline_mode<synchronous>, transform_indices = @transform_5, window_bounds = array<i64: 4, 1, 8>}, {pipeline_mode = #tpu.pipeline_mode<synchronous>, transform_indices = @transform_6, window_bounds = array<i64: 4, 32, 8>}, {pipeline_mode = #tpu.pipeline_mode<synchronous>, transform_indices = @transform_7, window_bounds = array<i64: 4, 1, 8>}, {pipeline_mode = #tpu.pipeline_mode<synchronous>, transform_indices = @transform_8, window_bounds = array<i64: 4, 8, 32>}, {pipeline_mode = #tpu.pipeline_mode<synchronous>, transform_indices = @transform_9, window_bounds = array<i64: 1, 32>}, {pipeline_mode = #tpu.pipeline_mode<synchronous>, transform_indices = @transform_10, window_bounds = array<i64: 1, 32>}, {pipeline_mode = #tpu.pipeline_mode<synchronous>, transform_indices = @transform_11, window_bounds = array<i64: 1, 32>}, {pipeline_mode = #tpu.pipeline_mode<synchronous>, transform_indices = @transform_12, window_bounds = array<i64: 32, 64>}, {pipeline_mode = #tpu.pipeline_mode<synchronous>, transform_indices = @transform_13, window_bounds = array<i64: 1, 64>}, {pipeline_mode = #tpu.pipeline_mode<synchronous>, transform_indices = @transform_14, window_bounds = array<i64: 64, 32>}, {pipeline_mode = #tpu.pipeline_mode<synchronous>, transform_indices = @transform_15, window_bounds = array<i64: 1, 32>}, {pipeline_mode = #tpu.pipeline_mode<synchronous>, transform_indices = @transform_16, window_bounds = array<i64: 1, 32>}, {pipeline_mode = #tpu.pipeline_mode<synchronous>, transform_indices = @transform_17, window_bounds = array<i64: 1, 32>}, {pipeline_mode = #tpu.pipeline_mode<synchronous>, transform_indices = @transform_18, window_bounds = array<i64: 16, 32>}]} {
    %c0 = arith.constant 0 : index
    %c0_0 = arith.constant 0 : index
    %0 = vector.load %arg1[%c0, %c0_0] : memref<16x32xf32, #tpu.memory_space<vmem>>, vector<16x32xf32>
    %1 = arith.truncf %0 : vector<16x32xf32> to vector<16x32xbf16>
    %c0_1 = arith.constant 0 : index
    %c0_2 = arith.constant 0 : index
    %2 = vector.load %arg2[%c0_1, %c0_2] : memref<2x8xf32, #tpu.memory_space<vmem>>, vector<2x8xf32>
    %cst = arith.constant 0.000000e+00 : f32
    %3 = vector.broadcast %cst : f32 to vector<16x32xf32>
    %c0_3 = arith.constant 0 : index
    %c0_4 = arith.constant 0 : index
    %c0_5 = arith.constant 0 : index
    %4 = vector.load %arg3[%c0_3, %c0_4, %c0_5] : memref<4x32x8xbf16, #tpu.memory_space<vmem>>, vector<1x32x8xbf16>
    %5 = vector.shape_cast %4 : vector<1x32x8xbf16> to vector<32x8xbf16>
    %cst_6 = arith.constant dense<0.000000e+00> : vector<16x8xf32>
    %6 = tpu.matmul %1, %5, %cst_6 {dimension_numbers = #tpu.dot_dimension_numbers<[1], [0], [0], [1], [0, 0, 1, 1], [], []>} : vector<16x32xbf16>, vector<32x8xbf16>, vector<16x8xf32> -> vector<16x8xf32>
    %c0_7 = arith.constant 0 : index
    %c0_8 = arith.constant 0 : index
    %c0_9 = arith.constant 0 : index
    %7 = vector.load %arg4[%c0_7, %c0_8, %c0_9] : memref<4x1x8xf32, #tpu.memory_space<vmem>>, vector<1x1x8xf32>
    %8 = vector.shape_cast %7 : vector<1x1x8xf32> to vector<1x8xf32>
    %9 = vector.broadcast %8 : vector<1x8xf32> to vector<16x8xf32>
    %10 = arith.addf %6, %9 : vector<16x8xf32>
    %11 = arith.truncf %10 : vector<16x8xf32> to vector<16x8xbf16>
    %c0_10 = arith.constant 0 : index
    %c0_11 = arith.constant 0 : index
    %c0_12 = arith.constant 0 : index
    %12 = vector.load %arg5[%c0_10, %c0_11, %c0_12] : memref<4x32x8xbf16, #tpu.memory_space<vmem>>, vector<1x32x8xbf16>
    %13 = vector.shape_cast %12 : vector<1x32x8xbf16> to vector<32x8xbf16>
    %cst_13 = arith.constant dense<0.000000e+00> : vector<16x8xf32>
    %14 = tpu.matmul %1, %13, %cst_13 {dimension_numbers = #tpu.dot_dimension_numbers<[1], [0], [0], [1], [0, 0, 1, 1], [], []>} : vector<16x32xbf16>, vector<32x8xbf16>, vector<16x8xf32> -> vector<16x8xf32>
    %c0_14 = arith.constant 0 : index
    %c0_15 = arith.constant 0 : index
    %c0_16 = arith.constant 0 : index
    %15 = vector.load %arg6[%c0_14, %c0_15, %c0_16] : memref<4x1x8xf32, #tpu.memory_space<vmem>>, vector<1x1x8xf32>
    %16 = vector.shape_cast %15 : vector<1x1x8xf32> to vector<1x8xf32>
    %17 = vector.broadcast %16 : vector<1x8xf32> to vector<16x8xf32>
    %18 = arith.addf %14, %17 : vector<16x8xf32>
    %19 = arith.truncf %18 : vector<16x8xf32> to vector<16x8xbf16>
    %c0_17 = arith.constant 0 : index
    %c0_18 = arith.constant 0 : index
    %c0_19 = arith.constant 0 : index
    %20 = vector.load %arg7[%c0_17, %c0_18, %c0_19] : memref<4x32x8xbf16, #tpu.memory_space<vmem>>, vector<1x32x8xbf16>
    %21 = vector.shape_cast %20 : vector<1x32x8xbf16> to vector<32x8xbf16>
    %cst_20 = arith.constant dense<0.000000e+00> : vector<16x8xf32>
    %22 = tpu.matmul %1, %21, %cst_20 {dimension_numbers = #tpu.dot_dimension_numbers<[1], [0], [0], [1], [0, 0, 1, 1], [], []>} : vector<16x32xbf16>, vector<32x8xbf16>, vector<16x8xf32> -> vector<16x8xf32>
    %c0_21 = arith.constant 0 : index
    %c0_22 = arith.constant 0 : index
    %c0_23 = arith.constant 0 : index
    %23 = vector.load %arg8[%c0_21, %c0_22, %c0_23] : memref<4x1x8xf32, #tpu.memory_space<vmem>>, vector<1x1x8xf32>
    %24 = vector.shape_cast %23 : vector<1x1x8xf32> to vector<1x8xf32>
    %25 = vector.broadcast %24 : vector<1x8xf32> to vector<16x8xf32>
    %26 = arith.addf %22, %25 : vector<16x8xf32>
    %27 = arith.truncf %26 : vector<16x8xf32> to vector<16x8xbf16>
    %28 = vector.extract_strided_slice %11 {offsets = [0, 0], sizes = [8, 8], strides = [1, 1]} : vector<16x8xbf16> to vector<8x8xbf16>
    %29 = vector.extract_strided_slice %19 {offsets = [0, 0], sizes = [8, 8], strides = [1, 1]} : vector<16x8xbf16> to vector<8x8xbf16>
    %30 = vector.extract_strided_slice %27 {offsets = [0, 0], sizes = [8, 8], strides = [1, 1]} : vector<16x8xbf16> to vector<8x8xbf16>
    %cst_24 = arith.constant dense<0.000000e+00> : vector<8x8xf32>
    %31 = tpu.matmul %28, %29, %cst_24 {dimension_numbers = #tpu.dot_dimension_numbers<[1], [1], [0], [0], [0, 0, 1, 0], [], []>} : vector<8x8xbf16>, vector<8x8xbf16>, vector<8x8xf32> -> vector<8x8xf32>
    %cst_25 = arith.constant 0.353553385 : f32
    %32 = vector.broadcast %cst_25 : f32 to vector<8x8xf32>
    %33 = arith.mulf %31, %32 : vector<8x8xf32>
    %34 = vector.extract_strided_slice %2 {offsets = [0, 0], sizes = [1, 8], strides = [1, 1]} : vector<2x8xf32> to vector<1x8xf32>
    %35 = vector.broadcast %34 : vector<1x8xf32> to vector<8x8xf32>
    %36 = arith.addf %33, %35 : vector<8x8xf32>
    %cst_26 = arith.constant dense<0xFF800000> : vector<8xf32>
    %37 = vector.multi_reduction <maximumf>, %36, %cst_26 [1] : vector<8x8xf32> to vector<8xf32>
    %38 = vector.shape_cast %37 : vector<8xf32> to vector<8x1xf32>
    %39 = vector.broadcast %38 : vector<8x1xf32> to vector<8x8xf32>
    %40 = arith.subf %36, %39 : vector<8x8xf32>
    %41 = math.exp %40 : vector<8x8xf32>
    %cst_27 = arith.constant dense<0.000000e+00> : vector<8xf32>
    %42 = vector.multi_reduction <add>, %41, %cst_27 [1] : vector<8x8xf32> to vector<8xf32>
    %43 = vector.shape_cast %42 : vector<8xf32> to vector<8x1xf32>
    %44 = tpu.reciprocal %43 {approx = true} : vector<8x1xf32> -> vector<8x1xf32>
    %45 = vector.broadcast %44 : vector<8x1xf32> to vector<8x8xf32>
    %46 = arith.mulf %41, %45 : vector<8x8xf32>
    %47 = arith.truncf %46 : vector<8x8xf32> to vector<8x8xbf16>
    %cst_28 = arith.constant dense<0.000000e+00> : vector<8x8xf32>
    %48 = tpu.matmul %47, %30, %cst_28 {dimension_numbers = #tpu.dot_dimension_numbers<[1], [0], [0], [1], [0, 0, 1, 1], [], []>} : vector<8x8xbf16>, vector<8x8xbf16>, vector<8x8xf32> -> vector<8x8xf32>
    %49 = vector.extract_strided_slice %11 {offsets = [8, 0], sizes = [8, 8], strides = [1, 1]} : vector<16x8xbf16> to vector<8x8xbf16>
    %50 = vector.extract_strided_slice %19 {offsets = [8, 0], sizes = [8, 8], strides = [1, 1]} : vector<16x8xbf16> to vector<8x8xbf16>
    %51 = vector.extract_strided_slice %27 {offsets = [8, 0], sizes = [8, 8], strides = [1, 1]} : vector<16x8xbf16> to vector<8x8xbf16>
    %cst_29 = arith.constant dense<0.000000e+00> : vector<8x8xf32>
    %52 = tpu.matmul %49, %50, %cst_29 {dimension_numbers = #tpu.dot_dimension_numbers<[1], [1], [0], [0], [0, 0, 1, 0], [], []>} : vector<8x8xbf16>, vector<8x8xbf16>, vector<8x8xf32> -> vector<8x8xf32>
    %cst_30 = arith.constant 0.353553385 : f32
    %53 = vector.broadcast %cst_30 : f32 to vector<8x8xf32>
    %54 = arith.mulf %52, %53 : vector<8x8xf32>
    %55 = vector.extract_strided_slice %2 {offsets = [1, 0], sizes = [1, 8], strides = [1, 1]} : vector<2x8xf32> to vector<1x8xf32>
    %56 = vector.broadcast %55 : vector<1x8xf32> to vector<8x8xf32>
    %57 = arith.addf %54, %56 : vector<8x8xf32>
    %cst_31 = arith.constant dense<0xFF800000> : vector<8xf32>
    %58 = vector.multi_reduction <maximumf>, %57, %cst_31 [1] : vector<8x8xf32> to vector<8xf32>
    %59 = vector.shape_cast %58 : vector<8xf32> to vector<8x1xf32>
    %60 = vector.broadcast %59 : vector<8x1xf32> to vector<8x8xf32>
    %61 = arith.subf %57, %60 : vector<8x8xf32>
    %62 = math.exp %61 : vector<8x8xf32>
    %cst_32 = arith.constant dense<0.000000e+00> : vector<8xf32>
    %63 = vector.multi_reduction <add>, %62, %cst_32 [1] : vector<8x8xf32> to vector<8xf32>
    %64 = vector.shape_cast %63 : vector<8xf32> to vector<8x1xf32>
    %65 = tpu.reciprocal %64 {approx = true} : vector<8x1xf32> -> vector<8x1xf32>
    %66 = vector.broadcast %65 : vector<8x1xf32> to vector<8x8xf32>
    %67 = arith.mulf %62, %66 : vector<8x8xf32>
    %68 = arith.truncf %67 : vector<8x8xf32> to vector<8x8xbf16>
    %cst_33 = arith.constant dense<0.000000e+00> : vector<8x8xf32>
    %69 = tpu.matmul %68, %51, %cst_33 {dimension_numbers = #tpu.dot_dimension_numbers<[1], [0], [0], [1], [0, 0, 1, 1], [], []>} : vector<8x8xbf16>, vector<8x8xbf16>, vector<8x8xf32> -> vector<8x8xf32>
    %70 = tpu.concatenate %48, %69 in 0 : vector<8x8xf32>, vector<8x8xf32> -> vector<16x8xf32>
    %71 = arith.truncf %70 : vector<16x8xf32> to vector<16x8xbf16>
    %c0_34 = arith.constant 0 : index
    %c0_35 = arith.constant 0 : index
    %c0_36 = arith.constant 0 : index
    %72 = vector.load %arg9[%c0_34, %c0_35, %c0_36] : memref<4x8x32xbf16, #tpu.memory_space<vmem>>, vector<1x8x32xbf16>
    %73 = vector.shape_cast %72 : vector<1x8x32xbf16> to vector<8x32xbf16>
    %cst_37 = arith.constant dense<0.000000e+00> : vector<16x32xf32>
    %74 = tpu.matmul %71, %73, %cst_37 {dimension_numbers = #tpu.dot_dimension_numbers<[1], [0], [0], [1], [0, 0, 1, 1], [], []>} : vector<16x8xbf16>, vector<8x32xbf16>, vector<16x32xf32> -> vector<16x32xf32>
    %75 = arith.addf %3, %74 : vector<16x32xf32>
    %c1 = arith.constant 1 : index
    %c0_38 = arith.constant 0 : index
    %c0_39 = arith.constant 0 : index
    %76 = vector.load %arg3[%c1, %c0_38, %c0_39] : memref<4x32x8xbf16, #tpu.memory_space<vmem>>, vector<1x32x8xbf16>
    %77 = vector.shape_cast %76 : vector<1x32x8xbf16> to vector<32x8xbf16>
    %cst_40 = arith.constant dense<0.000000e+00> : vector<16x8xf32>
    %78 = tpu.matmul %1, %77, %cst_40 {dimension_numbers = #tpu.dot_dimension_numbers<[1], [0], [0], [1], [0, 0, 1, 1], [], []>} : vector<16x32xbf16>, vector<32x8xbf16>, vector<16x8xf32> -> vector<16x8xf32>
    %c1_41 = arith.constant 1 : index
    %c0_42 = arith.constant 0 : index
    %c0_43 = arith.constant 0 : index
    %79 = vector.load %arg4[%c1_41, %c0_42, %c0_43] : memref<4x1x8xf32, #tpu.memory_space<vmem>>, vector<1x1x8xf32>
    %80 = vector.shape_cast %79 : vector<1x1x8xf32> to vector<1x8xf32>
    %81 = vector.broadcast %80 : vector<1x8xf32> to vector<16x8xf32>
    %82 = arith.addf %78, %81 : vector<16x8xf32>
    %83 = arith.truncf %82 : vector<16x8xf32> to vector<16x8xbf16>
    %c1_44 = arith.constant 1 : index
    %c0_45 = arith.constant 0 : index
    %c0_46 = arith.constant 0 : index
    %84 = vector.load %arg5[%c1_44, %c0_45, %c0_46] : memref<4x32x8xbf16, #tpu.memory_space<vmem>>, vector<1x32x8xbf16>
    %85 = vector.shape_cast %84 : vector<1x32x8xbf16> to vector<32x8xbf16>
    %cst_47 = arith.constant dense<0.000000e+00> : vector<16x8xf32>
    %86 = tpu.matmul %1, %85, %cst_47 {dimension_numbers = #tpu.dot_dimension_numbers<[1], [0], [0], [1], [0, 0, 1, 1], [], []>} : vector<16x32xbf16>, vector<32x8xbf16>, vector<16x8xf32> -> vector<16x8xf32>
    %c1_48 = arith.constant 1 : index
    %c0_49 = arith.constant 0 : index
    %c0_50 = arith.constant 0 : index
    %87 = vector.load %arg6[%c1_48, %c0_49, %c0_50] : memref<4x1x8xf32, #tpu.memory_space<vmem>>, vector<1x1x8xf32>
    %88 = vector.shape_cast %87 : vector<1x1x8xf32> to vector<1x8xf32>
    %89 = vector.broadcast %88 : vector<1x8xf32> to vector<16x8xf32>
    %90 = arith.addf %86, %89 : vector<16x8xf32>
    %91 = arith.truncf %90 : vector<16x8xf32> to vector<16x8xbf16>
    %c1_51 = arith.constant 1 : index
    %c0_52 = arith.constant 0 : index
    %c0_53 = arith.constant 0 : index
    %92 = vector.load %arg7[%c1_51, %c0_52, %c0_53] : memref<4x32x8xbf16, #tpu.memory_space<vmem>>, vector<1x32x8xbf16>
    %93 = vector.shape_cast %92 : vector<1x32x8xbf16> to vector<32x8xbf16>
    %cst_54 = arith.constant dense<0.000000e+00> : vector<16x8xf32>
    %94 = tpu.matmul %1, %93, %cst_54 {dimension_numbers = #tpu.dot_dimension_numbers<[1], [0], [0], [1], [0, 0, 1, 1], [], []>} : vector<16x32xbf16>, vector<32x8xbf16>, vector<16x8xf32> -> vector<16x8xf32>
    %c1_55 = arith.constant 1 : index
    %c0_56 = arith.constant 0 : index
    %c0_57 = arith.constant 0 : index
    %95 = vector.load %arg8[%c1_55, %c0_56, %c0_57] : memref<4x1x8xf32, #tpu.memory_space<vmem>>, vector<1x1x8xf32>
    %96 = vector.shape_cast %95 : vector<1x1x8xf32> to vector<1x8xf32>
    %97 = vector.broadcast %96 : vector<1x8xf32> to vector<16x8xf32>
    %98 = arith.addf %94, %97 : vector<16x8xf32>
    %99 = arith.truncf %98 : vector<16x8xf32> to vector<16x8xbf16>
    %100 = vector.extract_strided_slice %83 {offsets = [0, 0], sizes = [8, 8], strides = [1, 1]} : vector<16x8xbf16> to vector<8x8xbf16>
    %101 = vector.extract_strided_slice %91 {offsets = [0, 0], sizes = [8, 8], strides = [1, 1]} : vector<16x8xbf16> to vector<8x8xbf16>
    %102 = vector.extract_strided_slice %99 {offsets = [0, 0], sizes = [8, 8], strides = [1, 1]} : vector<16x8xbf16> to vector<8x8xbf16>
    %cst_58 = arith.constant dense<0.000000e+00> : vector<8x8xf32>
    %103 = tpu.matmul %100, %101, %cst_58 {dimension_numbers = #tpu.dot_dimension_numbers<[1], [1], [0], [0], [0, 0, 1, 0], [], []>} : vector<8x8xbf16>, vector<8x8xbf16>, vector<8x8xf32> -> vector<8x8xf32>
    %cst_59 = arith.constant 0.353553385 : f32
    %104 = vector.broadcast %cst_59 : f32 to vector<8x8xf32>
    %105 = arith.mulf %103, %104 : vector<8x8xf32>
    %106 = vector.extract_strided_slice %2 {offsets = [0, 0], sizes = [1, 8], strides = [1, 1]} : vector<2x8xf32> to vector<1x8xf32>
    %107 = vector.broadcast %106 : vector<1x8xf32> to vector<8x8xf32>
    %108 = arith.addf %105, %107 : vector<8x8xf32>
    %cst_60 = arith.constant dense<0xFF800000> : vector<8xf32>
    %109 = vector.multi_reduction <maximumf>, %108, %cst_60 [1] : vector<8x8xf32> to vector<8xf32>
    %110 = vector.shape_cast %109 : vector<8xf32> to vector<8x1xf32>
    %111 = vector.broadcast %110 : vector<8x1xf32> to vector<8x8xf32>
    %112 = arith.subf %108, %111 : vector<8x8xf32>
    %113 = math.exp %112 : vector<8x8xf32>
    %cst_61 = arith.constant dense<0.000000e+00> : vector<8xf32>
    %114 = vector.multi_reduction <add>, %113, %cst_61 [1] : vector<8x8xf32> to vector<8xf32>
    %115 = vector.shape_cast %114 : vector<8xf32> to vector<8x1xf32>
    %116 = tpu.reciprocal %115 {approx = true} : vector<8x1xf32> -> vector<8x1xf32>
    %117 = vector.broadcast %116 : vector<8x1xf32> to vector<8x8xf32>
    %118 = arith.mulf %113, %117 : vector<8x8xf32>
    %119 = arith.truncf %118 : vector<8x8xf32> to vector<8x8xbf16>
    %cst_62 = arith.constant dense<0.000000e+00> : vector<8x8xf32>
    %120 = tpu.matmul %119, %102, %cst_62 {dimension_numbers = #tpu.dot_dimension_numbers<[1], [0], [0], [1], [0, 0, 1, 1], [], []>} : vector<8x8xbf16>, vector<8x8xbf16>, vector<8x8xf32> -> vector<8x8xf32>
    %121 = vector.extract_strided_slice %83 {offsets = [8, 0], sizes = [8, 8], strides = [1, 1]} : vector<16x8xbf16> to vector<8x8xbf16>
    %122 = vector.extract_strided_slice %91 {offsets = [8, 0], sizes = [8, 8], strides = [1, 1]} : vector<16x8xbf16> to vector<8x8xbf16>
    %123 = vector.extract_strided_slice %99 {offsets = [8, 0], sizes = [8, 8], strides = [1, 1]} : vector<16x8xbf16> to vector<8x8xbf16>
    %cst_63 = arith.constant dense<0.000000e+00> : vector<8x8xf32>
    %124 = tpu.matmul %121, %122, %cst_63 {dimension_numbers = #tpu.dot_dimension_numbers<[1], [1], [0], [0], [0, 0, 1, 0], [], []>} : vector<8x8xbf16>, vector<8x8xbf16>, vector<8x8xf32> -> vector<8x8xf32>
    %cst_64 = arith.constant 0.353553385 : f32
    %125 = vector.broadcast %cst_64 : f32 to vector<8x8xf32>
    %126 = arith.mulf %124, %125 : vector<8x8xf32>
    %127 = vector.extract_strided_slice %2 {offsets = [1, 0], sizes = [1, 8], strides = [1, 1]} : vector<2x8xf32> to vector<1x8xf32>
    %128 = vector.broadcast %127 : vector<1x8xf32> to vector<8x8xf32>
    %129 = arith.addf %126, %128 : vector<8x8xf32>
    %cst_65 = arith.constant dense<0xFF800000> : vector<8xf32>
    %130 = vector.multi_reduction <maximumf>, %129, %cst_65 [1] : vector<8x8xf32> to vector<8xf32>
    %131 = vector.shape_cast %130 : vector<8xf32> to vector<8x1xf32>
    %132 = vector.broadcast %131 : vector<8x1xf32> to vector<8x8xf32>
    %133 = arith.subf %129, %132 : vector<8x8xf32>
    %134 = math.exp %133 : vector<8x8xf32>
    %cst_66 = arith.constant dense<0.000000e+00> : vector<8xf32>
    %135 = vector.multi_reduction <add>, %134, %cst_66 [1] : vector<8x8xf32> to vector<8xf32>
    %136 = vector.shape_cast %135 : vector<8xf32> to vector<8x1xf32>
    %137 = tpu.reciprocal %136 {approx = true} : vector<8x1xf32> -> vector<8x1xf32>
    %138 = vector.broadcast %137 : vector<8x1xf32> to vector<8x8xf32>
    %139 = arith.mulf %134, %138 : vector<8x8xf32>
    %140 = arith.truncf %139 : vector<8x8xf32> to vector<8x8xbf16>
    %cst_67 = arith.constant dense<0.000000e+00> : vector<8x8xf32>
    %141 = tpu.matmul %140, %123, %cst_67 {dimension_numbers = #tpu.dot_dimension_numbers<[1], [0], [0], [1], [0, 0, 1, 1], [], []>} : vector<8x8xbf16>, vector<8x8xbf16>, vector<8x8xf32> -> vector<8x8xf32>
    %142 = tpu.concatenate %120, %141 in 0 : vector<8x8xf32>, vector<8x8xf32> -> vector<16x8xf32>
    %143 = arith.truncf %142 : vector<16x8xf32> to vector<16x8xbf16>
    %c1_68 = arith.constant 1 : index
    %c0_69 = arith.constant 0 : index
    %c0_70 = arith.constant 0 : index
    %144 = vector.load %arg9[%c1_68, %c0_69, %c0_70] : memref<4x8x32xbf16, #tpu.memory_space<vmem>>, vector<1x8x32xbf16>
    %145 = vector.shape_cast %144 : vector<1x8x32xbf16> to vector<8x32xbf16>
    %cst_71 = arith.constant dense<0.000000e+00> : vector<16x32xf32>
    %146 = tpu.matmul %143, %145, %cst_71 {dimension_numbers = #tpu.dot_dimension_numbers<[1], [0], [0], [1], [0, 0, 1, 1], [], []>} : vector<16x8xbf16>, vector<8x32xbf16>, vector<16x32xf32> -> vector<16x32xf32>
    %147 = arith.addf %75, %146 : vector<16x32xf32>
    %c2 = arith.constant 2 : index
    %c0_72 = arith.constant 0 : index
    %c0_73 = arith.constant 0 : index
    %148 = vector.load %arg3[%c2, %c0_72, %c0_73] : memref<4x32x8xbf16, #tpu.memory_space<vmem>>, vector<1x32x8xbf16>
    %149 = vector.shape_cast %148 : vector<1x32x8xbf16> to vector<32x8xbf16>
    %cst_74 = arith.constant dense<0.000000e+00> : vector<16x8xf32>
    %150 = tpu.matmul %1, %149, %cst_74 {dimension_numbers = #tpu.dot_dimension_numbers<[1], [0], [0], [1], [0, 0, 1, 1], [], []>} : vector<16x32xbf16>, vector<32x8xbf16>, vector<16x8xf32> -> vector<16x8xf32>
    %c2_75 = arith.constant 2 : index
    %c0_76 = arith.constant 0 : index
    %c0_77 = arith.constant 0 : index
    %151 = vector.load %arg4[%c2_75, %c0_76, %c0_77] : memref<4x1x8xf32, #tpu.memory_space<vmem>>, vector<1x1x8xf32>
    %152 = vector.shape_cast %151 : vector<1x1x8xf32> to vector<1x8xf32>
    %153 = vector.broadcast %152 : vector<1x8xf32> to vector<16x8xf32>
    %154 = arith.addf %150, %153 : vector<16x8xf32>
    %155 = arith.truncf %154 : vector<16x8xf32> to vector<16x8xbf16>
    %c2_78 = arith.constant 2 : index
    %c0_79 = arith.constant 0 : index
    %c0_80 = arith.constant 0 : index
    %156 = vector.load %arg5[%c2_78, %c0_79, %c0_80] : memref<4x32x8xbf16, #tpu.memory_space<vmem>>, vector<1x32x8xbf16>
    %157 = vector.shape_cast %156 : vector<1x32x8xbf16> to vector<32x8xbf16>
    %cst_81 = arith.constant dense<0.000000e+00> : vector<16x8xf32>
    %158 = tpu.matmul %1, %157, %cst_81 {dimension_numbers = #tpu.dot_dimension_numbers<[1], [0], [0], [1], [0, 0, 1, 1], [], []>} : vector<16x32xbf16>, vector<32x8xbf16>, vector<16x8xf32> -> vector<16x8xf32>
    %c2_82 = arith.constant 2 : index
    %c0_83 = arith.constant 0 : index
    %c0_84 = arith.constant 0 : index
    %159 = vector.load %arg6[%c2_82, %c0_83, %c0_84] : memref<4x1x8xf32, #tpu.memory_space<vmem>>, vector<1x1x8xf32>
    %160 = vector.shape_cast %159 : vector<1x1x8xf32> to vector<1x8xf32>
    %161 = vector.broadcast %160 : vector<1x8xf32> to vector<16x8xf32>
    %162 = arith.addf %158, %161 : vector<16x8xf32>
    %163 = arith.truncf %162 : vector<16x8xf32> to vector<16x8xbf16>
    %c2_85 = arith.constant 2 : index
    %c0_86 = arith.constant 0 : index
    %c0_87 = arith.constant 0 : index
    %164 = vector.load %arg7[%c2_85, %c0_86, %c0_87] : memref<4x32x8xbf16, #tpu.memory_space<vmem>>, vector<1x32x8xbf16>
    %165 = vector.shape_cast %164 : vector<1x32x8xbf16> to vector<32x8xbf16>
    %cst_88 = arith.constant dense<0.000000e+00> : vector<16x8xf32>
    %166 = tpu.matmul %1, %165, %cst_88 {dimension_numbers = #tpu.dot_dimension_numbers<[1], [0], [0], [1], [0, 0, 1, 1], [], []>} : vector<16x32xbf16>, vector<32x8xbf16>, vector<16x8xf32> -> vector<16x8xf32>
    %c2_89 = arith.constant 2 : index
    %c0_90 = arith.constant 0 : index
    %c0_91 = arith.constant 0 : index
    %167 = vector.load %arg8[%c2_89, %c0_90, %c0_91] : memref<4x1x8xf32, #tpu.memory_space<vmem>>, vector<1x1x8xf32>
    %168 = vector.shape_cast %167 : vector<1x1x8xf32> to vector<1x8xf32>
    %169 = vector.broadcast %168 : vector<1x8xf32> to vector<16x8xf32>
    %170 = arith.addf %166, %169 : vector<16x8xf32>
    %171 = arith.truncf %170 : vector<16x8xf32> to vector<16x8xbf16>
    %172 = vector.extract_strided_slice %155 {offsets = [0, 0], sizes = [8, 8], strides = [1, 1]} : vector<16x8xbf16> to vector<8x8xbf16>
    %173 = vector.extract_strided_slice %163 {offsets = [0, 0], sizes = [8, 8], strides = [1, 1]} : vector<16x8xbf16> to vector<8x8xbf16>
    %174 = vector.extract_strided_slice %171 {offsets = [0, 0], sizes = [8, 8], strides = [1, 1]} : vector<16x8xbf16> to vector<8x8xbf16>
    %cst_92 = arith.constant dense<0.000000e+00> : vector<8x8xf32>
    %175 = tpu.matmul %172, %173, %cst_92 {dimension_numbers = #tpu.dot_dimension_numbers<[1], [1], [0], [0], [0, 0, 1, 0], [], []>} : vector<8x8xbf16>, vector<8x8xbf16>, vector<8x8xf32> -> vector<8x8xf32>
    %cst_93 = arith.constant 0.353553385 : f32
    %176 = vector.broadcast %cst_93 : f32 to vector<8x8xf32>
    %177 = arith.mulf %175, %176 : vector<8x8xf32>
    %178 = vector.extract_strided_slice %2 {offsets = [0, 0], sizes = [1, 8], strides = [1, 1]} : vector<2x8xf32> to vector<1x8xf32>
    %179 = vector.broadcast %178 : vector<1x8xf32> to vector<8x8xf32>
    %180 = arith.addf %177, %179 : vector<8x8xf32>
    %cst_94 = arith.constant dense<0xFF800000> : vector<8xf32>
    %181 = vector.multi_reduction <maximumf>, %180, %cst_94 [1] : vector<8x8xf32> to vector<8xf32>
    %182 = vector.shape_cast %181 : vector<8xf32> to vector<8x1xf32>
    %183 = vector.broadcast %182 : vector<8x1xf32> to vector<8x8xf32>
    %184 = arith.subf %180, %183 : vector<8x8xf32>
    %185 = math.exp %184 : vector<8x8xf32>
    %cst_95 = arith.constant dense<0.000000e+00> : vector<8xf32>
    %186 = vector.multi_reduction <add>, %185, %cst_95 [1] : vector<8x8xf32> to vector<8xf32>
    %187 = vector.shape_cast %186 : vector<8xf32> to vector<8x1xf32>
    %188 = tpu.reciprocal %187 {approx = true} : vector<8x1xf32> -> vector<8x1xf32>
    %189 = vector.broadcast %188 : vector<8x1xf32> to vector<8x8xf32>
    %190 = arith.mulf %185, %189 : vector<8x8xf32>
    %191 = arith.truncf %190 : vector<8x8xf32> to vector<8x8xbf16>
    %cst_96 = arith.constant dense<0.000000e+00> : vector<8x8xf32>
    %192 = tpu.matmul %191, %174, %cst_96 {dimension_numbers = #tpu.dot_dimension_numbers<[1], [0], [0], [1], [0, 0, 1, 1], [], []>} : vector<8x8xbf16>, vector<8x8xbf16>, vector<8x8xf32> -> vector<8x8xf32>
    %193 = vector.extract_strided_slice %155 {offsets = [8, 0], sizes = [8, 8], strides = [1, 1]} : vector<16x8xbf16> to vector<8x8xbf16>
    %194 = vector.extract_strided_slice %163 {offsets = [8, 0], sizes = [8, 8], strides = [1, 1]} : vector<16x8xbf16> to vector<8x8xbf16>
    %195 = vector.extract_strided_slice %171 {offsets = [8, 0], sizes = [8, 8], strides = [1, 1]} : vector<16x8xbf16> to vector<8x8xbf16>
    %cst_97 = arith.constant dense<0.000000e+00> : vector<8x8xf32>
    %196 = tpu.matmul %193, %194, %cst_97 {dimension_numbers = #tpu.dot_dimension_numbers<[1], [1], [0], [0], [0, 0, 1, 0], [], []>} : vector<8x8xbf16>, vector<8x8xbf16>, vector<8x8xf32> -> vector<8x8xf32>
    %cst_98 = arith.constant 0.353553385 : f32
    %197 = vector.broadcast %cst_98 : f32 to vector<8x8xf32>
    %198 = arith.mulf %196, %197 : vector<8x8xf32>
    %199 = vector.extract_strided_slice %2 {offsets = [1, 0], sizes = [1, 8], strides = [1, 1]} : vector<2x8xf32> to vector<1x8xf32>
    %200 = vector.broadcast %199 : vector<1x8xf32> to vector<8x8xf32>
    %201 = arith.addf %198, %200 : vector<8x8xf32>
    %cst_99 = arith.constant dense<0xFF800000> : vector<8xf32>
    %202 = vector.multi_reduction <maximumf>, %201, %cst_99 [1] : vector<8x8xf32> to vector<8xf32>
    %203 = vector.shape_cast %202 : vector<8xf32> to vector<8x1xf32>
    %204 = vector.broadcast %203 : vector<8x1xf32> to vector<8x8xf32>
    %205 = arith.subf %201, %204 : vector<8x8xf32>
    %206 = math.exp %205 : vector<8x8xf32>
    %cst_100 = arith.constant dense<0.000000e+00> : vector<8xf32>
    %207 = vector.multi_reduction <add>, %206, %cst_100 [1] : vector<8x8xf32> to vector<8xf32>
    %208 = vector.shape_cast %207 : vector<8xf32> to vector<8x1xf32>
    %209 = tpu.reciprocal %208 {approx = true} : vector<8x1xf32> -> vector<8x1xf32>
    %210 = vector.broadcast %209 : vector<8x1xf32> to vector<8x8xf32>
    %211 = arith.mulf %206, %210 : vector<8x8xf32>
    %212 = arith.truncf %211 : vector<8x8xf32> to vector<8x8xbf16>
    %cst_101 = arith.constant dense<0.000000e+00> : vector<8x8xf32>
    %213 = tpu.matmul %212, %195, %cst_101 {dimension_numbers = #tpu.dot_dimension_numbers<[1], [0], [0], [1], [0, 0, 1, 1], [], []>} : vector<8x8xbf16>, vector<8x8xbf16>, vector<8x8xf32> -> vector<8x8xf32>
    %214 = tpu.concatenate %192, %213 in 0 : vector<8x8xf32>, vector<8x8xf32> -> vector<16x8xf32>
    %215 = arith.truncf %214 : vector<16x8xf32> to vector<16x8xbf16>
    %c2_102 = arith.constant 2 : index
    %c0_103 = arith.constant 0 : index
    %c0_104 = arith.constant 0 : index
    %216 = vector.load %arg9[%c2_102, %c0_103, %c0_104] : memref<4x8x32xbf16, #tpu.memory_space<vmem>>, vector<1x8x32xbf16>
    %217 = vector.shape_cast %216 : vector<1x8x32xbf16> to vector<8x32xbf16>
    %cst_105 = arith.constant dense<0.000000e+00> : vector<16x32xf32>
    %218 = tpu.matmul %215, %217, %cst_105 {dimension_numbers = #tpu.dot_dimension_numbers<[1], [0], [0], [1], [0, 0, 1, 1], [], []>} : vector<16x8xbf16>, vector<8x32xbf16>, vector<16x32xf32> -> vector<16x32xf32>
    %219 = arith.addf %147, %218 : vector<16x32xf32>
    %c3 = arith.constant 3 : index
    %c0_106 = arith.constant 0 : index
    %c0_107 = arith.constant 0 : index
    %220 = vector.load %arg3[%c3, %c0_106, %c0_107] : memref<4x32x8xbf16, #tpu.memory_space<vmem>>, vector<1x32x8xbf16>
    %221 = vector.shape_cast %220 : vector<1x32x8xbf16> to vector<32x8xbf16>
    %cst_108 = arith.constant dense<0.000000e+00> : vector<16x8xf32>
    %222 = tpu.matmul %1, %221, %cst_108 {dimension_numbers = #tpu.dot_dimension_numbers<[1], [0], [0], [1], [0, 0, 1, 1], [], []>} : vector<16x32xbf16>, vector<32x8xbf16>, vector<16x8xf32> -> vector<16x8xf32>
    %c3_109 = arith.constant 3 : index
    %c0_110 = arith.constant 0 : index
    %c0_111 = arith.constant 0 : index
    %223 = vector.load %arg4[%c3_109, %c0_110, %c0_111] : memref<4x1x8xf32, #tpu.memory_space<vmem>>, vector<1x1x8xf32>
    %224 = vector.shape_cast %223 : vector<1x1x8xf32> to vector<1x8xf32>
    %225 = vector.broadcast %224 : vector<1x8xf32> to vector<16x8xf32>
    %226 = arith.addf %222, %225 : vector<16x8xf32>
    %227 = arith.truncf %226 : vector<16x8xf32> to vector<16x8xbf16>
    %c3_112 = arith.constant 3 : index
    %c0_113 = arith.constant 0 : index
    %c0_114 = arith.constant 0 : index
    %228 = vector.load %arg5[%c3_112, %c0_113, %c0_114] : memref<4x32x8xbf16, #tpu.memory_space<vmem>>, vector<1x32x8xbf16>
    %229 = vector.shape_cast %228 : vector<1x32x8xbf16> to vector<32x8xbf16>
    %cst_115 = arith.constant dense<0.000000e+00> : vector<16x8xf32>
    %230 = tpu.matmul %1, %229, %cst_115 {dimension_numbers = #tpu.dot_dimension_numbers<[1], [0], [0], [1], [0, 0, 1, 1], [], []>} : vector<16x32xbf16>, vector<32x8xbf16>, vector<16x8xf32> -> vector<16x8xf32>
    %c3_116 = arith.constant 3 : index
    %c0_117 = arith.constant 0 : index
    %c0_118 = arith.constant 0 : index
    %231 = vector.load %arg6[%c3_116, %c0_117, %c0_118] : memref<4x1x8xf32, #tpu.memory_space<vmem>>, vector<1x1x8xf32>
    %232 = vector.shape_cast %231 : vector<1x1x8xf32> to vector<1x8xf32>
    %233 = vector.broadcast %232 : vector<1x8xf32> to vector<16x8xf32>
    %234 = arith.addf %230, %233 : vector<16x8xf32>
    %235 = arith.truncf %234 : vector<16x8xf32> to vector<16x8xbf16>
    %c3_119 = arith.constant 3 : index
    %c0_120 = arith.constant 0 : index
    %c0_121 = arith.constant 0 : index
    %236 = vector.load %arg7[%c3_119, %c0_120, %c0_121] : memref<4x32x8xbf16, #tpu.memory_space<vmem>>, vector<1x32x8xbf16>
    %237 = vector.shape_cast %236 : vector<1x32x8xbf16> to vector<32x8xbf16>
    %cst_122 = arith.constant dense<0.000000e+00> : vector<16x8xf32>
    %238 = tpu.matmul %1, %237, %cst_122 {dimension_numbers = #tpu.dot_dimension_numbers<[1], [0], [0], [1], [0, 0, 1, 1], [], []>} : vector<16x32xbf16>, vector<32x8xbf16>, vector<16x8xf32> -> vector<16x8xf32>
    %c3_123 = arith.constant 3 : index
    %c0_124 = arith.constant 0 : index
    %c0_125 = arith.constant 0 : index
    %239 = vector.load %arg8[%c3_123, %c0_124, %c0_125] : memref<4x1x8xf32, #tpu.memory_space<vmem>>, vector<1x1x8xf32>
    %240 = vector.shape_cast %239 : vector<1x1x8xf32> to vector<1x8xf32>
    %241 = vector.broadcast %240 : vector<1x8xf32> to vector<16x8xf32>
    %242 = arith.addf %238, %241 : vector<16x8xf32>
    %243 = arith.truncf %242 : vector<16x8xf32> to vector<16x8xbf16>
    %244 = vector.extract_strided_slice %227 {offsets = [0, 0], sizes = [8, 8], strides = [1, 1]} : vector<16x8xbf16> to vector<8x8xbf16>
    %245 = vector.extract_strided_slice %235 {offsets = [0, 0], sizes = [8, 8], strides = [1, 1]} : vector<16x8xbf16> to vector<8x8xbf16>
    %246 = vector.extract_strided_slice %243 {offsets = [0, 0], sizes = [8, 8], strides = [1, 1]} : vector<16x8xbf16> to vector<8x8xbf16>
    %cst_126 = arith.constant dense<0.000000e+00> : vector<8x8xf32>
    %247 = tpu.matmul %244, %245, %cst_126 {dimension_numbers = #tpu.dot_dimension_numbers<[1], [1], [0], [0], [0, 0, 1, 0], [], []>} : vector<8x8xbf16>, vector<8x8xbf16>, vector<8x8xf32> -> vector<8x8xf32>
    %cst_127 = arith.constant 0.353553385 : f32
    %248 = vector.broadcast %cst_127 : f32 to vector<8x8xf32>
    %249 = arith.mulf %247, %248 : vector<8x8xf32>
    %250 = vector.extract_strided_slice %2 {offsets = [0, 0], sizes = [1, 8], strides = [1, 1]} : vector<2x8xf32> to vector<1x8xf32>
    %251 = vector.broadcast %250 : vector<1x8xf32> to vector<8x8xf32>
    %252 = arith.addf %249, %251 : vector<8x8xf32>
    %cst_128 = arith.constant dense<0xFF800000> : vector<8xf32>
    %253 = vector.multi_reduction <maximumf>, %252, %cst_128 [1] : vector<8x8xf32> to vector<8xf32>
    %254 = vector.shape_cast %253 : vector<8xf32> to vector<8x1xf32>
    %255 = vector.broadcast %254 : vector<8x1xf32> to vector<8x8xf32>
    %256 = arith.subf %252, %255 : vector<8x8xf32>
    %257 = math.exp %256 : vector<8x8xf32>
    %cst_129 = arith.constant dense<0.000000e+00> : vector<8xf32>
    %258 = vector.multi_reduction <add>, %257, %cst_129 [1] : vector<8x8xf32> to vector<8xf32>
    %259 = vector.shape_cast %258 : vector<8xf32> to vector<8x1xf32>
    %260 = tpu.reciprocal %259 {approx = true} : vector<8x1xf32> -> vector<8x1xf32>
    %261 = vector.broadcast %260 : vector<8x1xf32> to vector<8x8xf32>
    %262 = arith.mulf %257, %261 : vector<8x8xf32>
    %263 = arith.truncf %262 : vector<8x8xf32> to vector<8x8xbf16>
    %cst_130 = arith.constant dense<0.000000e+00> : vector<8x8xf32>
    %264 = tpu.matmul %263, %246, %cst_130 {dimension_numbers = #tpu.dot_dimension_numbers<[1], [0], [0], [1], [0, 0, 1, 1], [], []>} : vector<8x8xbf16>, vector<8x8xbf16>, vector<8x8xf32> -> vector<8x8xf32>
    %265 = vector.extract_strided_slice %227 {offsets = [8, 0], sizes = [8, 8], strides = [1, 1]} : vector<16x8xbf16> to vector<8x8xbf16>
    %266 = vector.extract_strided_slice %235 {offsets = [8, 0], sizes = [8, 8], strides = [1, 1]} : vector<16x8xbf16> to vector<8x8xbf16>
    %267 = vector.extract_strided_slice %243 {offsets = [8, 0], sizes = [8, 8], strides = [1, 1]} : vector<16x8xbf16> to vector<8x8xbf16>
    %cst_131 = arith.constant dense<0.000000e+00> : vector<8x8xf32>
    %268 = tpu.matmul %265, %266, %cst_131 {dimension_numbers = #tpu.dot_dimension_numbers<[1], [1], [0], [0], [0, 0, 1, 0], [], []>} : vector<8x8xbf16>, vector<8x8xbf16>, vector<8x8xf32> -> vector<8x8xf32>
    %cst_132 = arith.constant 0.353553385 : f32
    %269 = vector.broadcast %cst_132 : f32 to vector<8x8xf32>
    %270 = arith.mulf %268, %269 : vector<8x8xf32>
    %271 = vector.extract_strided_slice %2 {offsets = [1, 0], sizes = [1, 8], strides = [1, 1]} : vector<2x8xf32> to vector<1x8xf32>
    %272 = vector.broadcast %271 : vector<1x8xf32> to vector<8x8xf32>
    %273 = arith.addf %270, %272 : vector<8x8xf32>
    %cst_133 = arith.constant dense<0xFF800000> : vector<8xf32>
    %274 = vector.multi_reduction <maximumf>, %273, %cst_133 [1] : vector<8x8xf32> to vector<8xf32>
    %275 = vector.shape_cast %274 : vector<8xf32> to vector<8x1xf32>
    %276 = vector.broadcast %275 : vector<8x1xf32> to vector<8x8xf32>
    %277 = arith.subf %273, %276 : vector<8x8xf32>
    %278 = math.exp %277 : vector<8x8xf32>
    %cst_134 = arith.constant dense<0.000000e+00> : vector<8xf32>
    %279 = vector.multi_reduction <add>, %278, %cst_134 [1] : vector<8x8xf32> to vector<8xf32>
    %280 = vector.shape_cast %279 : vector<8xf32> to vector<8x1xf32>
    %281 = tpu.reciprocal %280 {approx = true} : vector<8x1xf32> -> vector<8x1xf32>
    %282 = vector.broadcast %281 : vector<8x1xf32> to vector<8x8xf32>
    %283 = arith.mulf %278, %282 : vector<8x8xf32>
    %284 = arith.truncf %283 : vector<8x8xf32> to vector<8x8xbf16>
    %cst_135 = arith.constant dense<0.000000e+00> : vector<8x8xf32>
    %285 = tpu.matmul %284, %267, %cst_135 {dimension_numbers = #tpu.dot_dimension_numbers<[1], [0], [0], [1], [0, 0, 1, 1], [], []>} : vector<8x8xbf16>, vector<8x8xbf16>, vector<8x8xf32> -> vector<8x8xf32>
    %286 = tpu.concatenate %264, %285 in 0 : vector<8x8xf32>, vector<8x8xf32> -> vector<16x8xf32>
    %287 = arith.truncf %286 : vector<16x8xf32> to vector<16x8xbf16>
    %c3_136 = arith.constant 3 : index
    %c0_137 = arith.constant 0 : index
    %c0_138 = arith.constant 0 : index
    %288 = vector.load %arg9[%c3_136, %c0_137, %c0_138] : memref<4x8x32xbf16, #tpu.memory_space<vmem>>, vector<1x8x32xbf16>
    %289 = vector.shape_cast %288 : vector<1x8x32xbf16> to vector<8x32xbf16>
    %cst_139 = arith.constant dense<0.000000e+00> : vector<16x32xf32>
    %290 = tpu.matmul %287, %289, %cst_139 {dimension_numbers = #tpu.dot_dimension_numbers<[1], [0], [0], [1], [0, 0, 1, 1], [], []>} : vector<16x8xbf16>, vector<8x32xbf16>, vector<16x32xf32> -> vector<16x32xf32>
    %291 = arith.addf %219, %290 : vector<16x32xf32>
    %c0_140 = arith.constant 0 : index
    %c0_141 = arith.constant 0 : index
    %292 = vector.load %arg10[%c0_140, %c0_141] : memref<1x32xf32, #tpu.memory_space<vmem>>, vector<1x32xf32>
    %293 = vector.broadcast %292 : vector<1x32xf32> to vector<16x32xf32>
    %294 = arith.addf %291, %293 : vector<16x32xf32>
    %295 = arith.addf %294, %0 : vector<16x32xf32>
    %c0_142 = arith.constant 0 : index
    %c0_143 = arith.constant 0 : index
    %296 = vector.load %arg11[%c0_142, %c0_143] : memref<1x32xf32, #tpu.memory_space<vmem>>, vector<1x32xf32>
    %c0_144 = arith.constant 0 : index
    %c0_145 = arith.constant 0 : index
    %297 = vector.load %arg12[%c0_144, %c0_145] : memref<1x32xf32, #tpu.memory_space<vmem>>, vector<1x32xf32>
    %cst_146 = arith.constant dense<0.000000e+00> : vector<16xf32>
    %298 = vector.multi_reduction <add>, %295, %cst_146 [1] : vector<16x32xf32> to vector<16xf32>
    %299 = vector.shape_cast %298 : vector<16xf32> to vector<16x1xf32>
    %cst_147 = arith.constant 3.200000e+01 : f32
    %300 = vector.broadcast %cst_147 : f32 to vector<16x1xf32>
    %301 = arith.divf %299, %300 : vector<16x1xf32>
    %302 = vector.broadcast %301 : vector<16x1xf32> to vector<16x32xf32>
    %303 = arith.subf %295, %302 : vector<16x32xf32>
    %304 = arith.mulf %303, %303 : vector<16x32xf32>
    %cst_148 = arith.constant dense<0.000000e+00> : vector<16xf32>
    %305 = vector.multi_reduction <add>, %304, %cst_148 [1] : vector<16x32xf32> to vector<16xf32>
    %306 = vector.shape_cast %305 : vector<16xf32> to vector<16x1xf32>
    %cst_149 = arith.constant 3.200000e+01 : f32
    %307 = vector.broadcast %cst_149 : f32 to vector<16x1xf32>
    %308 = arith.divf %306, %307 : vector<16x1xf32>
    %309 = vector.broadcast %301 : vector<16x1xf32> to vector<16x32xf32>
    %310 = arith.subf %295, %309 : vector<16x32xf32>
    %cst_150 = arith.constant 9.99999996E-13 : f32
    %311 = vector.broadcast %cst_150 : f32 to vector<16x1xf32>
    %312 = arith.addf %308, %311 : vector<16x1xf32>
    %313 = math.rsqrt %312 : vector<16x1xf32>
    %314 = vector.broadcast %313 : vector<16x1xf32> to vector<16x32xf32>
    %315 = arith.mulf %310, %314 : vector<16x32xf32>
    %316 = vector.broadcast %296 : vector<1x32xf32> to vector<16x32xf32>
    %317 = arith.mulf %315, %316 : vector<16x32xf32>
    %318 = vector.broadcast %297 : vector<1x32xf32> to vector<16x32xf32>
    %319 = arith.addf %317, %318 : vector<16x32xf32>
    %320 = arith.truncf %319 : vector<16x32xf32> to vector<16x32xbf16>
    %c0_151 = arith.constant 0 : index
    %c0_152 = arith.constant 0 : index
    %321 = vector.load %arg13[%c0_151, %c0_152] : memref<32x64xbf16, #tpu.memory_space<vmem>>, vector<32x64xbf16>
    %cst_153 = arith.constant dense<0.000000e+00> : vector<16x64xf32>
    %322 = tpu.matmul %320, %321, %cst_153 {dimension_numbers = #tpu.dot_dimension_numbers<[1], [0], [0], [1], [0, 0, 1, 1], [], []>} : vector<16x32xbf16>, vector<32x64xbf16>, vector<16x64xf32> -> vector<16x64xf32>
    %c0_154 = arith.constant 0 : index
    %c0_155 = arith.constant 0 : index
    %323 = vector.load %arg14[%c0_154, %c0_155] : memref<1x64xf32, #tpu.memory_space<vmem>>, vector<1x64xf32>
    %324 = vector.broadcast %323 : vector<1x64xf32> to vector<16x64xf32>
    %325 = arith.addf %322, %324 : vector<16x64xf32>
    %cst_156 = arith.constant 5.000000e-01 : f32
    %326 = vector.broadcast %cst_156 : f32 to vector<16x64xf32>
    %327 = arith.mulf %325, %326 : vector<16x64xf32>
    %cst_157 = arith.constant 2.000000e+00 : f32
    %328 = math.sqrt %cst_157 : f32
    %329 = vector.broadcast %328 : f32 to vector<16x64xf32>
    %330 = arith.divf %325, %329 : vector<16x64xf32>
    %331 = math.erf %330 : vector<16x64xf32>
    %cst_158 = arith.constant 1.000000e+00 : f32
    %332 = vector.broadcast %cst_158 : f32 to vector<16x64xf32>
    %333 = arith.addf %332, %331 : vector<16x64xf32>
    %334 = arith.mulf %327, %333 : vector<16x64xf32>
    %335 = arith.truncf %334 : vector<16x64xf32> to vector<16x64xbf16>
    %c0_159 = arith.constant 0 : index
    %c0_160 = arith.constant 0 : index
    %336 = vector.load %arg15[%c0_159, %c0_160] : memref<64x32xbf16, #tpu.memory_space<vmem>>, vector<64x32xbf16>
    %cst_161 = arith.constant dense<0.000000e+00> : vector<16x32xf32>
    %337 = tpu.matmul %335, %336, %cst_161 {dimension_numbers = #tpu.dot_dimension_numbers<[1], [0], [0], [1], [0, 0, 1, 1], [], []>} : vector<16x64xbf16>, vector<64x32xbf16>, vector<16x32xf32> -> vector<16x32xf32>
    %c0_162 = arith.constant 0 : index
    %c0_163 = arith.constant 0 : index
    %338 = vector.load %arg16[%c0_162, %c0_163] : memref<1x32xf32, #tpu.memory_space<vmem>>, vector<1x32xf32>
    %339 = vector.broadcast %338 : vector<1x32xf32> to vector<16x32xf32>
    %340 = arith.addf %337, %339 : vector<16x32xf32>
    %341 = arith.addf %340, %319 : vector<16x32xf32>
    %c0_164 = arith.constant 0 : index
    %c0_165 = arith.constant 0 : index
    %342 = vector.load %arg17[%c0_164, %c0_165] : memref<1x32xf32, #tpu.memory_space<vmem>>, vector<1x32xf32>
    %c0_166 = arith.constant 0 : index
    %c0_167 = arith.constant 0 : index
    %343 = vector.load %arg18[%c0_166, %c0_167] : memref<1x32xf32, #tpu.memory_space<vmem>>, vector<1x32xf32>
    %cst_168 = arith.constant dense<0.000000e+00> : vector<16xf32>
    %344 = vector.multi_reduction <add>, %341, %cst_168 [1] : vector<16x32xf32> to vector<16xf32>
    %345 = vector.shape_cast %344 : vector<16xf32> to vector<16x1xf32>
    %cst_169 = arith.constant 3.200000e+01 : f32
    %346 = vector.broadcast %cst_169 : f32 to vector<16x1xf32>
    %347 = arith.divf %345, %346 : vector<16x1xf32>
    %348 = vector.broadcast %347 : vector<16x1xf32> to vector<16x32xf32>
    %349 = arith.subf %341, %348 : vector<16x32xf32>
    %350 = arith.mulf %349, %349 : vector<16x32xf32>
    %cst_170 = arith.constant dense<0.000000e+00> : vector<16xf32>
    %351 = vector.multi_reduction <add>, %350, %cst_170 [1] : vector<16x32xf32> to vector<16xf32>
    %352 = vector.shape_cast %351 : vector<16xf32> to vector<16x1xf32>
    %cst_171 = arith.constant 3.200000e+01 : f32
    %353 = vector.broadcast %cst_171 : f32 to vector<16x1xf32>
    %354 = arith.divf %352, %353 : vector<16x1xf32>
    %355 = vector.broadcast %347 : vector<16x1xf32> to vector<16x32xf32>
    %356 = arith.subf %341, %355 : vector<16x32xf32>
    %cst_172 = arith.constant 9.99999996E-13 : f32
    %357 = vector.broadcast %cst_172 : f32 to vector<16x1xf32>
    %358 = arith.addf %354, %357 : vector<16x1xf32>
    %359 = math.rsqrt %358 : vector<16x1xf32>
    %360 = vector.broadcast %359 : vector<16x1xf32> to vector<16x32xf32>
    %361 = arith.mulf %356, %360 : vector<16x32xf32>
    %362 = vector.broadcast %342 : vector<1x32xf32> to vector<16x32xf32>
    %363 = arith.mulf %361, %362 : vector<16x32xf32>
    %364 = vector.broadcast %343 : vector<1x32xf32> to vector<16x32xf32>
    %365 = arith.addf %363, %364 : vector<16x32xf32>
    %c0_173 = arith.constant 0 : index
    %c0_174 = arith.constant 0 : index
    %366 = vector.load %arg19[%c0_173, %c0_174] : memref<16x32xf32, #tpu.memory_space<vmem>>, vector<16x32xf32>
    tpu.vector_store %arg19[%c0_173, %c0_174], %365 {strides = array<i32>} : memref<16x32xf32, #tpu.memory_space<vmem>>, vector<16x32xf32>,
    return
  }
  func.func @transform_0(%arg0: i32) -> (i32, i32) {
    %c0_i32 = arith.constant 0 : i32
    %c0_i32_0 = arith.constant 0 : i32
    %c0_i32_1 = arith.constant 0 : i32
    return %c0_i32, %c0_i32_0 : i32, i32
  }
  func.func @transform_1(%arg0: i32) -> (i32, i32) {
    %c0_i32 = arith.constant 0 : i32
    %c0_i32_0 = arith.constant 0 : i32
    %c0_i32_1 = arith.constant 0 : i32
    return %c0_i32, %c0_i32_0 : i32, i32
  }
  func.func @transform_2(%arg0: i32) -> (i32, i32, i32) {
    %c0_i32 = arith.constant 0 : i32
    %c0_i32_0 = arith.constant 0 : i32
    %c0_i32_1 = arith.constant 0 : i32
    %c0_i32_2 = arith.constant 0 : i32
    return %c0_i32, %c0_i32_0, %c0_i32_1 : i32, i32, i32
  }
  func.func @transform_3(%arg0: i32) -> (i32, i32, i32) {
    %c0_i32 = arith.constant 0 : i32
    %c0_i32_0 = arith.constant 0 : i32
    %c0_i32_1 = arith.constant 0 : i32
    %c0_i32_2 = arith.constant 0 : i32
    return %c0_i32, %c0_i32_0, %c0_i32_1 : i32, i32, i32
  }
  func.func @transform_4(%arg0: i32) -> (i32, i32, i32) {
    %c0_i32 = arith.constant 0 : i32
    %c0_i32_0 = arith.constant 0 : i32
    %c0_i32_1 = arith.constant 0 : i32
    %c0_i32_2 = arith.constant 0 : i32
    return %c0_i32, %c0_i32_0, %c0_i32_1 : i32, i32, i32
  }
  func.func @transform_5(%arg0: i32) -> (i32, i32, i32) {
    %c0_i32 = arith.constant 0 : i32
    %c0_i32_0 = arith.constant 0 : i32
    %c0_i32_1 = arith.constant 0 : i32
    %c0_i32_2 = arith.constant 0 : i32
    return %c0_i32, %c0_i32_0, %c0_i32_1 : i32, i32, i32
  }
  func.func @transform_6(%arg0: i32) -> (i32, i32, i32) {
    %c0_i32 = arith.constant 0 : i32
    %c0_i32_0 = arith.constant 0 : i32
    %c0_i32_1 = arith.constant 0 : i32
    %c0_i32_2 = arith.constant 0 : i32
    return %c0_i32, %c0_i32_0, %c0_i32_1 : i32, i32, i32
  }
  func.func @transform_7(%arg0: i32) -> (i32, i32, i32) {
    %c0_i32 = arith.constant 0 : i32
    %c0_i32_0 = arith.constant 0 : i32
    %c0_i32_1 = arith.constant 0 : i32
    %c0_i32_2 = arith.constant 0 : i32
    return %c0_i32, %c0_i32_0, %c0_i32_1 : i32, i32, i32
  }
  func.func @transform_8(%arg0: i32) -> (i32, i32, i32) {
    %c0_i32 = arith.constant 0 : i32
    %c0_i32_0 = arith.constant 0 : i32
    %c0_i32_1 = arith.constant 0 : i32
    %c0_i32_2 = arith.constant 0 : i32
    return %c0_i32, %c0_i32_0, %c0_i32_1 : i32, i32, i32
  }
  func.func @transform_9(%arg0: i32) -> (i32, i32) {
    %c0_i32 = arith.constant 0 : i32
    %c0_i32_0 = arith.constant 0 : i32
    %c0_i32_1 = arith.constant 0 : i32
    return %c0_i32, %c0_i32_0 : i32, i32
  }
  func.func @transform_10(%arg0: i32) -> (i32, i32) {
    %c0_i32 = arith.constant 0 : i32
    %c0_i32_0 = arith.constant 0 : i32
    %c0_i32_1 = arith.constant 0 : i32
    return %c0_i32, %c0_i32_0 : i32, i32
  }
  func.func @transform_11(%arg0: i32) -> (i32, i32) {
    %c0_i32 = arith.constant 0 : i32
    %c0_i32_0 = arith.constant 0 : i32
    %c0_i32_1 = arith.constant 0 : i32
    return %c0_i32, %c0_i32_0 : i32, i32
  }
  func.func @transform_12(%arg0: i32) -> (i32, i32) {
    %c0_i32 = arith.constant 0 : i32
    %c0_i32_0 = arith.constant 0 : i32
    %c0_i32_1 = arith.constant 0 : i32
    return %c0_i32, %c0_i32_0 : i32, i32
  }
  func.func @transform_13(%arg0: i32) -> (i32, i32) {
    %c0_i32 = arith.constant 0 : i32
    %c0_i32_0 = arith.constant 0 : i32
    %c0_i32_1 = arith.constant 0 : i32
    return %c0_i32, %c0_i32_0 : i32, i32
  }
  func.func @transform_14(%arg0: i32) -> (i32, i32) {
    %c0_i32 = arith.constant 0 : i32
    %c0_i32_0 = arith.constant 0 : i32
    %c0_i32_1 = arith.constant 0 : i32
    return %c0_i32, %c0_i32_0 : i32, i32
  }
  func.func @transform_15(%arg0: i32) -> (i32, i32) {
    %c0_i32 = arith.constant 0 : i32
    %c0_i32_0 = arith.constant 0 : i32
    %c0_i32_1 = arith.constant 0 : i32
    return %c0_i32, %c0_i32_0 : i32, i32
  }
  func.func @transform_16(%arg0: i32) -> (i32, i32) {
    %c0_i32 = arith.constant 0 : i32
    %c0_i32_0 = arith.constant 0 : i32
    %c0_i32_1 = arith.constant 0 : i32
    return %c0_i32, %c0_i32_0 : i32, i32
  }
  func.func @transform_17(%arg0: i32) -> (i32, i32) {
    %c0_i32 = arith.constant 0 : i32
    %c0_i32_0 = arith.constant 0 : i32
    %c0_i32_1 = arith.constant 0 : i32
    return %c0_i32, %c0_i32_0 : i32, i32
  }
  func.func @transform_18(%arg0: i32) -> (i32, i32) {
    %c0_i32 = arith.constant 0 : i32
    %c0_i32_0 = arith.constant 0 : i32
    %c0_i32_1 = arith.constant 0 : i32
    return %c0_i32, %c0_i32_0 : i32, i32
  }
}

</mosaic_0001>

<bundles_post_ra>
// kernel: tpu_custom_call.1
= control target key start
LH: loop header
LB: loop body
LE: loop exit
PB: predicated region body
PF: predicated region fallthrough
CT: control target
= control target key end

     0   :  { %s3322_s0 = inlined_call_operand.vmem [shape: f32[16,32], index: 0, kind: input, shape index: {}]   ;;  %s3323_s1 = inlined_call_operand.vmem [shape: f32[2,8], index: 1, kind: input, shape index: {}]   ;;  %s3324_s2 = inlined_call_operand.vmem [shape: bf16[4,32,8], index: 2, kind: input, shape index: {}]   ;;  %s3325_s3 = inlined_call_operand.vmem [shape: f32[4,1,8], index: 3, kind: input, shape index: {}]   ;;  %s3326_s4 = inlined_call_operand.vmem [shape: bf16[4,32,8], index: 4, kind: input, shape index: {}]   ;;  %s3327_s5 = inlined_call_operand.vmem [shape: f32[4,1,8], index: 5, kind: input, shape index: {}]   ;;  %s3328_s6 = inlined_call_operand.vmem [shape: bf16[4,32,8], index: 6, kind: input, shape index: {}]   ;;  %s3329_s7 = inlined_call_operand.vmem [shape: f32[4,1,8], index: 7, kind: input, shape index: {}]   ;;  %s3330_s8 = inlined_call_operand.vmem [shape: bf16[4,8,32], index: 8, kind: input, shape index: {}]   ;;  %s3331_s9 = inlined_call_operand.vmem [shape: f32[1,32], index: 9, kind: input, shape index: {}]   ;;  %s3332_s10 = inlined_call_operand.vmem [shape: f32[1,32], index: 10, kind: input, shape index: {}]   ;;  %s3333_s11 = inlined_call_operand.vmem [shape: f32[1,32], index: 11, kind: input, shape index: {}]   ;;  %s3334_s12 = inlined_call_operand.vmem [shape: bf16[32,64], index: 12, kind: input, shape index: {}]   ;;  %s3335_s13 = inlined_call_operand.vmem [shape: f32[1,64], index: 13, kind: input, shape index: {}]   ;;  %s3336_s14 = inlined_call_operand.vmem [shape: bf16[64,32], index: 14, kind: input, shape index: {}]   ;;  %s3337_s15 = inlined_call_operand.vmem [shape: f32[1,32], index: 15, kind: input, shape index: {}]   ;;  %s3338_s16 = inlined_call_operand.vmem [shape: f32[1,32], index: 16, kind: input, shape index: {}]   ;;  %s3339_s17 = inlined_call_operand.vmem [shape: f32[1,32], index: 17, kind: input, shape index: {}]   ;;  %s3340_s18 = inlined_call_operand.hbm [shape: f32[16,32], index: 18, kind: output, shape index: {}]  }
   0x1   :  { %3343 = sst [smem:[#allocation5_spill]] %s3322_s0 }
   0x2   :  { %3344 = sst [smem:[#allocation6_spill]] %s3323_s1 }
   0x3   :  { %3345 = sst [smem:[#allocation7_spill]] %s3324_s2 }
   0x4   :  { %v2692_v0 = vld [vmem:[%s3326_s4] sm:$0xff]   ;;  %v2792_v1 = vmov 0.0   ;;  %v2693_v2 = vld [vmem:[%s3326_s4 + $0x8] sm:$0xff]   ;;  %s3346_s1 = sld [smem:[#allocation7_spill]]  ;;  %vm2793_vm0 = vmmov 0   ;;  %s3347_s22 = sld [smem:[#allocation5_spill]] }
   0x5   :  { %2459 = vmatprep.subr.bf16.mxu1 %v2792_v1  ;;  %2451 = vmatprep.subr.bf16.mxu0 %v2792_v1  ;;  %vm88_vm1 = vcmask 261120  }
   0x6   :  { %2460 = vmatpush3.bf16.msra.mxu1 %v2692_v0  ;;  %2463 = vmatprep.mubr.msk.bf16.mxu1 %vm2793_vm0, %v2792_v1 }
   0x7   :  { %2461 = vmatprep.subr.bf16.mxu1 %v2792_v1  ;;  %2455 = vmatprep.mubr.msk.bf16.mxu0 %vm2793_vm0, %v2792_v1 }
   0xa   :  { %v2694_v3 = vld [vmem:[%s3346_s1] sm:$0xff]   ;;  %v62_v5 = vld [vmem:[%s3347_s22 + $0x8] sm:$0xff]  ;;  %2462 = vmatpush3.bf16.msra.mxu1 %v2693_v2 }
   0xb   :  { %v61_v4 = vld [vmem:[%s3347_s22] sm:$0xff]  ;;  %2452 = vmatpush3.bf16.msra.mxu0 %v2694_v3  ;;  %v2695_v6 = vld [vmem:[%s3346_s1 + $0x8] sm:$0xff]   ;;  %2475 = vmatprep.subr.bf16.mxu1 %v2792_v1 }
   0xc   :  { %v2917_v7 = vpack.c.bf16 %v62_v5, %v61_v4  ;;  %2453 = vmatprep.subr.bf16.mxu0 %v2792_v1 }
   0xe   :  { %2464 = vmatmul.mubr.msk.bf16.vlgmr.msra.gmra.mrb[0].mxu1 %vm88_vm1, %v2917_v7 }
   0xf   :  { %2454 = vmatpush3.bf16.msra.mxu0 %v2695_v6  ;;  %2477 = vmatprep.mubr.msk.bf16.mxu1 %vm2793_vm0, %v2792_v1 }
  0x10   :  { %2467 = vmatprep.subr.bf16.mxu0 %v2792_v1 }
  0x12   :  { %2456 = vmatmul.mubr.msk.bf16.vlgmr.msra.gmra.mrb[0].mxu0 %vm88_vm1, %v2917_v7 }
  0x13   :  { %2471 = vmatprep.mubr.msk.bf16.mxu0 %vm2793_vm0, %v2792_v1 }
  0x14   :  { %23 = vsyncpa [#allocation3], 0  ;;  %v2240_v8 = vld [vmem:[%s3327_s5] ss:$0 sm:$0xff]  ;;  %vm264_vm2 = vcmask 64512   ;;  %v2697_v29 = vld [vmem:[%s3328_s6 + $0x8] sm:$0xff]   ;;  %v312_v30 = vlaneseq }
  0x15   :  { %v2236_v10 = vld [vmem:[%s3325_s3] ss:$0 sm:$0xff]  ;;  %s3348_s23 = sld [smem:[#allocation6_spill]]  ;;  %vm332_vm3 = vcmask 1043456   ;;  %vm2127_vm4 = vcmask 523264   ;;  %s2794_s0 = smov [#allocation2]  }
  0x16   :  { %v2696_v28 = vld [vmem:[%s3328_s6] sm:$0xff]   ;;  %v313_v31 = vshrl.u32 %v312_v30, 7  ;;  %s2225_s19 = sshll.u32 %s2794_s0, 4  ;;  %s2226_s19 = int_to_ptr.vmem [resolvable:$true] %s2225_s19 }
  0x17   :  { %2468 = vmatpush3.bf16.msra.mxu0 %v2696_v28  ;;  %v2244_v63 = vld [vmem:[%s3329_s7] ss:$0 sm:$0xff]  ;;  %s2768_s20 = scalar_lea.vmem %s2226_s19, 256  ;;  %p2773_p1 = scmp.lt.s32.totalorder %s2226_s19, %s2226_s19 }
  0x18   :  { %2469 = vmatprep.subr.bf16.mxu0 %v2792_v1  ;;  %v314_v32 = vsub.s32 0, %v313_v31  ;;  %v429_v41 = vsub.s32 1, %v313_v31  ;;  %p2769_p0 = scmp.ne.s32.totalorder %s2226_s19, %s2768_s20  ;;  %p2774_p2 = scmp.lt.s32.totalorder %s2768_s20, %s2768_s20 }
  0x1a   :  { %p2775_p3 = por %p2774_p2, %p2773_p1 }
  0x1b   :  { %2470 = vmatpush3.bf16.msra.mxu0 %v2697_v29  ;;  %v64_v33 = vld [vmem:[%s3348_s23] sm:$0x3] }
  0x1c   :  { %2481 = vmatprep.subr.bf16.mxu0 %v2792_v1  ;;  %v2961_v34 = vrot.slane %v64_v33, %v314_v32  ;;  %v2965_v43 = vrot.slane %v64_v33, %v429_v41  ;;  %p2776_p4 = pnand %p2775_p3, %p2769_p0 }
  0x1e   :  { %2472 = vmatmul.mubr.msk.bf16.vlgmr.msra.gmra.mrb[4].mxu0 %vm88_vm1, %v2917_v7 }
  0x1f   :  { %2483 = vmatprep.mubr.msk.bf16.mxu0 %vm2793_vm0, %v2792_v1 }
  0xe1   :  { %v191_v9 = vpop.f32.mrb[0].mxu1 }
  0xe2   :  { %v2465_v11 = vpop.f32.mrb[1].mxu1  ;;  %v192_v14 = vadd.f32 %v2240_v8, %v191_v9  ;;  %v2701_v9 = vld [vmem:[%s3346_s1 + $0x18] sm:$0xff]  }
  0xe3   :  { %v194_v12 = vpop.f32.mrb[2].mxu1 }
  0xe4   :  { %v195_v15 = vadd.f32 %v2240_v8, %v194_v12  ;;  %v2466_v16 = vpop.f32.mrb[3].mxu1  ;;  %v2700_v8 = vld [vmem:[%s3346_s1 + $0x10] sm:$0xff]  }
  0xe5   :  { %v126_v13 = vpop.f32.mrb[0].mxu0 }
  0xe6   :  { %v127_v17 = vadd.f32 %v2236_v10, %v126_v13  ;;  %v2457_v18 = vpop.f32.mrb[1].mxu0  ;;  %v198_v20 = vpack.c.bf16 %v195_v15, %v192_v14 }
  0xe7   :  { %v129_v19 = vpop.f32.mrb[2].mxu0 }
  0xe8   :  { %v130_v21 = vadd.f32 %v2236_v10, %v129_v19  ;;  %v2458_v22 = vpop.f32.mrb[3].mxu0  ;;  %v269_v24 = vsel %vm264_vm2, %v198_v20, 0  ;;  %v379_v25 = vrot.slane %v198_v20, 4  ;;  %v2698_v19 = vld [vmem:[%s3326_s4 + $0x10] sm:$0xff]  }
  0xe9   :  { %2476 = vmatpush3.bf16.xpose.msra.mxu1 %v269_v24 }
  0xea   :  { %v133_v23 = vpack.c.bf16 %v130_v21, %v127_v17  ;;  %2487 = vmatprep.subr.bf16.mxu1 %v2792_v1  ;;  %v384_v26 = vsel %vm264_vm2, %v379_v25, 0  ;;  %v2699_v21 = vld [vmem:[%s3326_s4 + $0x18] sm:$0xff]  }
  0xec   :  { %v377_v27 = vrot.slane %v133_v23, 4 }
  0xf0   :  { %2478 = vmatmul.mubr.msk.bf16.vlgmr.msra.gmra.mrb[4].mxu1 %vm264_vm2, %v133_v23  ;;  %v2257_v23 = vld [vmem:[%s3325_s3 + $0x1] ss:$0 sm:$0xff] }
  0xf1   :  { %2488 = vmatpush3.bf16.xpose.msra.mxu1 %v384_v26  ;;  %2489 = vmatprep.mubr.msk.bf16.mxu1 %vm2793_vm0, %v2792_v1  ;;  %v256_v51 = vpop.f32.mrb[4].mxu0 }
  0xf2   :  { %2499 = vmatprep.subr.bf16.mxu1 %v2792_v1  ;;  %v2473_v52 = vpop.f32.mrb[5].mxu0  ;;  %v257_v0 = vadd.f32 %v2244_v63, %v256_v51 }
  0xf3   :  { %v259_v2 = vpop.f32.mrb[6].mxu0 }
  0xf4   :  { %v2474_v3 = vpop.f32.mrb[7].mxu0  ;;  %v260_v4 = vadd.f32 %v2244_v63, %v259_v2 }
  0xf6   :  { %v263_v5 = vpack.c.bf16 %v260_v4, %v257_v0 }
  0xf8   :  { %2490 = vmatmul.mubr.msk.bf16.vlgmr.msra.gmra.mrb[8].mxu1 %vm264_vm2, %v377_v27  ;;  %v334_v6 = vsel %vm332_vm3, %v263_v5, 0  ;;  %v445_v14 = vrot.slane %v263_v5, 4 }
  0xf9   :  { %2503 = vmatprep.mubr.msk.bf16.mxu1 %vm2793_vm0, %v2792_v1  ;;  %2482 = vmatpush3.bf16.msra.mxu0 %v334_v6  ;;  %v2275_v6 = vld [vmem:[%s3329_s7 + $0x1] ss:$0 sm:$0xff] }
  0xfa   :  { %2493 = vmatprep.subr.bf16.mxu0 %v2792_v1  ;;  %2500 = vmatpush3.bf16.msra.mxu1 %v2700_v8  ;;  %v450_v16 = vsel %vm332_vm3, %v445_v14, 0 }
  0xfb   :  { %2501 = vmatprep.subr.bf16.mxu1 %v2792_v1 }
  0xfe   :  { %2502 = vmatpush3.bf16.msra.mxu1 %v2701_v9 }
  0xff   :  { %2515 = vmatprep.subr.bf16.mxu1 %v2792_v1 }
 0x101   :  { %2504 = vmatmul.mubr.msk.bf16.vlgmr.msra.gmra.mrb[12].mxu1 %vm88_vm1, %v2917_v7 }
 0x102   :  { %2519 = vmatprep.mubr.msk.bf16.mxu1 %vm2793_vm0, %v2792_v1 }
 0x1c3   :  { %v305_v35 = vpop.f32.mrb[4].mxu1 }
 0x1c4   :  { %v311_v36 = vmul.f32 0.35355338, %v305_v35  ;;  %v2479_v37 = vpop.f32.mrb[5].mxu1 }
 0x1c5   :  { %v308_v38 = vpop.f32.mrb[6].mxu1 }
 0x1c6   :  { %v2480_v39 = vpop.f32.mrb[7].mxu1  ;;  %v316_v40 = vadd.f32 %v2961_v34, %v311_v36 }
 0x1c8   :  { %v317_v42 = vsel %vm264_vm2, %v316_v40, -inf }
 0x1c9   :  { %318 = vmax.xlane.f32.xlu0 %v317_v42 }
 0x1cb   :  { %v420_v44 = vpop.f32.mrb[8].mxu1 }
 0x1cc   :  { %v426_v45 = vmul.f32 0.35355338, %v420_v44  ;;  %v2491_v46 = vpop.f32.mrb[9].mxu1 }
 0x1cd   :  { %v423_v47 = vpop.f32.mrb[10].mxu1 }
 0x1ce   :  { %v2492_v48 = vpop.f32.mrb[11].mxu1  ;;  %v431_v49 = vadd.f32 %v2965_v43, %v426_v45 }
 0x1d0   :  { %v432_v50 = vsel %vm264_vm2, %v431_v49, -inf }
 0x1d1   :  { %433 = vmax.xlane.f32.xlu0 %v432_v50 }
 0x1d4   :  { %v553_v22 = vpop.f32.mrb[12].mxu1 }
 0x1d5   :  { %v2505_v24 = vpop.f32.mrb[13].mxu1  ;;  %v554_v25 = vadd.f32 %v2257_v23, %v553_v22 }
 0x1d6   :  { %v556_v26 = vpop.f32.mrb[14].mxu1 }
 0x1d7   :  { %v557_v27 = vadd.f32 %v2257_v23, %v556_v26  ;;  %v2506_v28 = vpop.f32.mrb[15].mxu1 }
 0x1d9   :  { %v560_v29 = vpack.c.bf16 %v557_v27, %v554_v25 }
 0x1db   :  { %v802_v52 = vrot.slane %v560_v29, 4 }
 0x256   :  { %v319_v53 = vpop.xlane.xlu0 %318 }
 0x257   :  { %v320_v54 = vsub.f32 %v316_v40, %v319_v53  ;;  %v2266_v40 = vld [vmem:[%s3327_s5 + $0x1] ss:$0 sm:$0xff]  ;;  %v2702_v53 = vld [vmem:[%s3328_s6 + $0x10] sm:$0xff]  }
 0x258   :  { %2516 = vmatpush3.bf16.msra.mxu1 %v2702_v53 }
 0x259   :  { %v321_v55 = vmul.f32 1.442695, %v320_v54  ;;  %v2703_v54 = vld [vmem:[%s3328_s6 + $0x18] sm:$0xff]   ;;  %2517 = vmatprep.subr.bf16.mxu1 %v2792_v1 }
 0x25b   :  { %2722 = vpow2.f32 %v321_v55 }
 0x25c   :  { %2518 = vmatpush3.bf16.msra.mxu1 %v2703_v54  ;;  %v2707_v54 = vld [vmem:[%s3346_s1 + $0x28] sm:$0xff]  }
 0x25d   :  { %2529 = vmatprep.subr.bf16.mxu1 %v2792_v1 }
 0x25e   :  { %v434_v56 = vpop.xlane.xlu0 %433 }
 0x25f   :  { %v435_v57 = vsub.f32 %v431_v49, %v434_v56  ;;  %2520 = vmatmul.mubr.msk.bf16.vlgmr.msra.gmra.mrb[16].mxu1 %vm88_vm1, %v2917_v7 }
 0x260   :  { %2531 = vmatprep.mubr.msk.bf16.mxu1 %vm2793_vm0, %v2792_v1 }
 0x261   :  { %v436_v58 = vmul.f32 1.442695, %v435_v57 }
 0x263   :  { %2724 = vpow2.f32 %v436_v58 }
 0x265   :  { %v2723_v59 = vpop.eup %2722 }
 0x266   :  { %v323_v60 = vsel %vm264_vm2, %v2723_v59, 0.0 }
 0x267   :  { %324 = vadd.xlane.f32.xlu1 %v323_v60 }
 0x26d   :  { %v2725_v61 = vpop.eup %2724 }
 0x26e   :  { %v438_v62 = vsel %vm264_vm2, %v2725_v61, 0.0 }
 0x26f   :  { %439 = vadd.xlane.f32.xlu1 %v438_v62 }
 0x2f4   :  { %v325_v10 = vpop.xlane.xlu1 %324 }
 0x2f5   :  { %2726 = vrcp.f32 %v325_v10 }
 0x2fc   :  { %v440_v11 = vpop.xlane.xlu1 %439 }
 0x2fd   :  { %2728 = vrcp.f32 %v440_v11 }
 0x2ff   :  { %v2727_v12 = vpop.eup %2726 }
 0x300   :  { %v327_v13 = vmul.f32 %v2727_v12, %v2723_v59 }
 0x302   :  { %v328_v15 = vpack.c.bf16 %v327_v13, %v327_v13 }
 0x304   :  { %2484 = vmatmul.mubr.msk.bf16.vlgmr.msra.gmra.mrb[8].mxu0 %vm264_vm2, %v328_v15 }
 0x305   :  { %2494 = vmatpush3.bf16.msra.mxu0 %v450_v16  ;;  %2495 = vmatprep.mubr.msk.bf16.mxu0 %vm2793_vm0, %v2792_v1 }
 0x306   :  { %2507 = vmatprep.subr.bf16.mxu0 %v2792_v1 }
 0x307   :  { %v2729_v17 = vpop.eup %2728 }
 0x308   :  { %v442_v18 = vmul.f32 %v2729_v17, %v2725_v61 }
 0x30a   :  { %v443_v20 = vpack.c.bf16 %v442_v18, %v442_v18 }
 0x30c   :  { %2496 = vmatmul.mubr.msk.bf16.vlgmr.msra.gmra.mrb[12].mxu0 %vm264_vm2, %v443_v20 }
 0x30d   :  { %2508 = vmatpush3.bf16.msra.mxu0 %v2698_v19  ;;  %2511 = vmatprep.mubr.msk.bf16.mxu0 %vm2793_vm0, %v2792_v1 }
 0x30e   :  { %2509 = vmatprep.subr.bf16.mxu0 %v2792_v1 }
 0x311   :  { %2510 = vmatpush3.bf16.msra.mxu0 %v2699_v21 }
 0x312   :  { %2523 = vmatprep.subr.bf16.mxu0 %v2792_v1 }
 0x314   :  { %2512 = vmatmul.mubr.msk.bf16.vlgmr.msra.gmra.mrb[16].mxu0 %vm88_vm1, %v2917_v7 }
 0x315   :  { %2525 = vmatprep.mubr.msk.bf16.mxu0 %vm2793_vm0, %v2792_v1 }
 0x332   :  { %v687_v8 = vpop.f32.mrb[16].mxu1 }
 0x333   :  { %v688_v9 = vadd.f32 %v2275_v6, %v687_v8  ;;  %v2521_v10 = vpop.f32.mrb[17].mxu1 }
 0x334   :  { %v690_v11 = vpop.f32.mrb[18].mxu1 }
 0x335   :  { %v691_v12 = vadd.f32 %v2275_v6, %v690_v11  ;;  %v2522_v13 = vpop.f32.mrb[19].mxu1 }
 0x337   :  { %v694_v14 = vpack.c.bf16 %v691_v12, %v688_v9  ;;  %v2291_v12 = vld [vmem:[%s3325_s3 + $0x2] ss:$0 sm:$0xff] }
 0x339   :  { %v759_v25 = vsel %vm332_vm3, %v694_v14, 0 }
 0x33a   :  { %2530 = vmatpush3.bf16.msra.mxu1 %v759_v25 }
 0x33b   :  { %2541 = vmatprep.subr.bf16.mxu1 %v2792_v1 }
 0x3d7   :  { %v3011_v30 = vpop.f32.mrb[8].mxu0 }
 0x3d8   :  { %v2485_v31 = vpop.f32.mrb[9].mxu0 }
 0x3d9   :  { %v373_v32 = vpop.f32.mrb[10].mxu0 }
 0x3da   :  { %v2486_v33 = vpop.f32.mrb[11].mxu0 }
 0x3df   :  { %v3013_v35 = vpop.f32.mrb[12].mxu0 }
 0x3e0   :  { %v492_v36 = vpack.c.bf16 %v3013_v35, %v3011_v30  ;;  %v2497_v37 = vpop.f32.mrb[13].mxu0  ;;  %v2705_v30 = vld [vmem:[%s3326_s4 + $0x28] sm:$0xff]  }
 0x3e1   :  { %v489_v38 = vpop.f32.mrb[14].mxu0 }
 0x3e2   :  { %v2498_v39 = vpop.f32.mrb[15].mxu0  ;;  %v493_v38 = vld [vmem:[%s3330_s8] sm:$0xf] }
 0x3e7   :  { %v620_v41 = vpop.f32.mrb[16].mxu0 }
 0x3e8   :  { %v2513_v42 = vpop.f32.mrb[17].mxu0  ;;  %v621_v45 = vadd.f32 %v2266_v40, %v620_v41  ;;  %v967_v41 = vsel %vm332_vm3, %v493_v38, 0 }
 0x3e9   :  { %v623_v44 = vpop.f32.mrb[18].mxu0  ;;  %v2704_v42 = vld [vmem:[%s3326_s4 + $0x20] sm:$0xff]  }
 0x3ea   :  { %v624_v46 = vadd.f32 %v2266_v40, %v623_v44  ;;  %v2514_v47 = vpop.f32.mrb[19].mxu0  ;;  %v2283_v44 = vld [vmem:[%s3330_s8 + $0x4] sm:$0xf] }
 0x3eb   :  { %v920_v35 = vsel %vm332_vm3, %v2283_v44, 0 }
 0x3ec   :  { %v627_v48 = vpack.c.bf16 %v624_v46, %v621_v45 }
 0x3ee   :  { %v699_v49 = vsel %vm264_vm2, %v627_v48, 0  ;;  %v804_v50 = vrot.slane %v627_v48, 4 }
 0x3ef   :  { %2524 = vmatpush3.bf16.xpose.msra.mxu0 %v699_v49  ;;  %v2706_v49 = vld [vmem:[%s3346_s1 + $0x20] sm:$0xff]  }
 0x3f0   :  { %2535 = vmatprep.subr.bf16.mxu0 %v2792_v1  ;;  %v809_v51 = vsel %vm264_vm2, %v804_v50, 0 }
 0x3f6   :  { %2526 = vmatmul.mubr.msk.bf16.vlgmr.msra.gmra.mrb[20].mxu0 %vm264_vm2, %v560_v29  ;;  %v866_v29 = vrot.slane %v694_v14, 4 }
 0x3f7   :  { %2536 = vmatpush3.bf16.xpose.msra.mxu0 %v809_v51  ;;  %2537 = vmatprep.mubr.msk.bf16.mxu0 %vm2793_vm0, %v2792_v1 }
 0x3f8   :  { %2547 = vmatprep.subr.bf16.mxu0 %v2792_v1  ;;  %v871_v33 = vsel %vm332_vm3, %v866_v29, 0 }
 0x3fe   :  { %2538 = vmatmul.mubr.msk.bf16.vlgmr.msra.gmra.mrb[24].mxu0 %vm264_vm2, %v802_v52 }
 0x3ff   :  { %2549 = vmatprep.mubr.msk.bf16.mxu0 %vm2793_vm0, %v2792_v1  ;;  %2548 = vmatpush3.bf16.msra.mxu0 %v920_v35 }
 0x400   :  { %2559 = vmatprep.subr.bf16.mxu0 %v2792_v1 }
 0x4c9   :  { %v735_v55 = vpop.f32.mrb[20].mxu0 }
 0x4ca   :  { %v741_v56 = vmul.f32 0.35355338, %v735_v55  ;;  %v2527_v57 = vpop.f32.mrb[21].mxu0 }
 0x4cb   :  { %v738_v58 = vpop.f32.mrb[22].mxu0 }
 0x4cc   :  { %v2528_v59 = vpop.f32.mrb[23].mxu0  ;;  %v742_v60 = vadd.f32 %v741_v56, %v2961_v34 }
 0x4cd   :  { %v2300_v59 = vld [vmem:[%s3327_s5 + $0x2] ss:$0 sm:$0xff] }
 0x4ce   :  { %v743_v61 = vsel %vm264_vm2, %v742_v60, -inf }
 0x4cf   :  { %744 = vmax.xlane.f32.xlu0 %v743_v61 }
 0x4d1   :  { %v845_v62 = vpop.f32.mrb[24].mxu0 }
 0x4d2   :  { %v851_v63 = vmul.f32 0.35355338, %v845_v62  ;;  %v2539_v0 = vpop.f32.mrb[25].mxu0 }
 0x4d3   :  { %v848_v2 = vpop.f32.mrb[26].mxu0 }
 0x4d4   :  { %v2540_v3 = vpop.f32.mrb[27].mxu0  ;;  %v852_v4 = vadd.f32 %v851_v63, %v2965_v43 }
 0x4d6   :  { %v853_v5 = vsel %vm264_vm2, %v852_v4, -inf }
 0x4d7   :  { %854 = vmax.xlane.f32.xlu1 %v853_v5 }
 0x55c   :  { %v745_v15 = vpop.xlane.xlu0 %744 }
 0x55d   :  { %v746_v16 = vsub.f32 %v742_v60, %v745_v15 }
 0x55f   :  { %v747_v17 = vmul.f32 1.442695, %v746_v16 }
 0x561   :  { %2730 = vpow2.f32 %v747_v17 }
 0x564   :  { %v855_v18 = vpop.xlane.xlu1 %854 }
 0x565   :  { %v856_v19 = vsub.f32 %v852_v4, %v855_v18 }
 0x567   :  { %v857_v20 = vmul.f32 1.442695, %v856_v19 }
 0x569   :  { %2732 = vpow2.f32 %v857_v20 }
 0x56b   :  { %v2731_v21 = vpop.eup %2730 }
 0x56c   :  { %v749_v22 = vsel %vm264_vm2, %v2731_v21, 0.0 }
 0x56d   :  { %750 = vadd.xlane.f32.xlu0 %v749_v22 }
 0x573   :  { %v2733_v23 = vpop.eup %2732 }
 0x574   :  { %v859_v24 = vsel %vm264_vm2, %v2733_v23, 0.0 }
 0x575   :  { %860 = vadd.xlane.f32.xlu1 %v859_v24  ;;  %v2709_v24 = vld [vmem:[%s3328_s6 + $0x28] sm:$0xff]  }
 0x5fa   :  { %v751_v26 = vpop.xlane.xlu0 %750 }
 0x5fb   :  { %2734 = vrcp.f32 %v751_v26 }
 0x602   :  { %v861_v27 = vpop.xlane.xlu1 %860 }
 0x603   :  { %2736 = vrcp.f32 %v861_v27 }
 0x605   :  { %v2735_v28 = vpop.eup %2734 }
 0x606   :  { %v753_v31 = vmul.f32 %v2735_v28, %v2731_v21 }
 0x608   :  { %v754_v32 = vpack.c.bf16 %v753_v31, %v753_v31 }
 0x60a   :  { %2532 = vmatmul.mubr.msk.bf16.vlgmr.msra.gmra.mrb[20].mxu1 %vm264_vm2, %v754_v32 }
 0x60b   :  { %2542 = vmatpush3.bf16.msra.mxu1 %v871_v33  ;;  %2543 = vmatprep.mubr.msk.bf16.mxu1 %vm2793_vm0, %v2792_v1 }
 0x60c   :  { %2553 = vmatprep.subr.bf16.mxu1 %v2792_v1 }
 0x60d   :  { %v2737_v37 = vpop.eup %2736 }
 0x60e   :  { %v863_v39 = vmul.f32 %v2737_v37, %v2733_v23  ;;  %v2708_v23 = vld [vmem:[%s3328_s6 + $0x20] sm:$0xff]  }
 0x610   :  { %v864_v40 = vpack.c.bf16 %v863_v39, %v863_v39 }
 0x612   :  { %2544 = vmatmul.mubr.msk.bf16.vlgmr.msra.gmra.mrb[24].mxu1 %vm264_vm2, %v864_v40 }
 0x613   :  { %2554 = vmatpush3.bf16.msra.mxu1 %v967_v41  ;;  %2555 = vmatprep.mubr.msk.bf16.mxu1 %vm2793_vm0, %v2792_v1 }
 0x614   :  { %2567 = vmatprep.subr.bf16.mxu1 %v2792_v1 }
 0x61a   :  { %2556 = vmatmul.mubr.msk.bf16.vlgmr.msra.gmra.mrb[28].mxu1 %vm264_vm2, %v492_v36 }
 0x61b   :  { %2571 = vmatprep.mubr.msk.bf16.mxu1 %vm2793_vm0, %v2792_v1  ;;  %2568 = vmatpush3.bf16.msra.mxu1 %v2704_v42 }
 0x61c   :  { %2569 = vmatprep.subr.bf16.mxu1 %v2792_v1 }
 0x61f   :  { %2570 = vmatpush3.bf16.msra.mxu1 %v2705_v30 }
 0x620   :  { %2583 = vmatprep.subr.bf16.mxu1 %v2792_v1 }
 0x622   :  { %2572 = vmatmul.mubr.msk.bf16.vlgmr.msra.gmra.mrb[32].mxu1 %vm88_vm1, %v2917_v7 }
 0x623   :  { %2585 = vmatprep.mubr.msk.bf16.mxu1 %vm2793_vm0, %v2792_v1 }
 0x6dd   :  { %v795_v36 = vpop.f32.mrb[20].mxu1 }
 0x6de   :  { %v2533_v45 = vpop.f32.mrb[21].mxu1 }
 0x6df   :  { %v798_v46 = vpop.f32.mrb[22].mxu1 }
 0x6e0   :  { %v2534_v47 = vpop.f32.mrb[23].mxu1 }
 0x6e5   :  { %v907_v48 = vpop.f32.mrb[24].mxu1 }
 0x6e6   :  { %v913_v50 = vpack.c.bf16 %v907_v48, %v795_v36  ;;  %v2545_v51 = vpop.f32.mrb[25].mxu1 }
 0x6e7   :  { %v910_v52 = vpop.f32.mrb[26].mxu1 }
 0x6e8   :  { %v2546_v53 = vpop.f32.mrb[27].mxu1  ;;  %2550 = vmatmul.mubr.msk.bf16.vlgmr.msra.gmra.mrb[28].mxu0 %vm264_vm2, %v913_v50 }
 0x6e9   :  { %2560 = vmatpush3.bf16.msra.mxu0 %v2706_v49  ;;  %2563 = vmatprep.mubr.msk.bf16.mxu0 %vm2793_vm0, %v2792_v1  ;;  %v2309_v53 = vld [vmem:[%s3329_s7 + $0x2] ss:$0 sm:$0xff] }
 0x6ea   :  { %2561 = vmatprep.subr.bf16.mxu0 %v2792_v1 }
 0x6ed   :  { %v1003_v55 = vpop.f32.mrb[28].mxu1  ;;  %2562 = vmatpush3.bf16.msra.mxu0 %v2707_v54 }
 0x6ee   :  { %v2557_v56 = vpop.f32.mrb[29].mxu1  ;;  %2575 = vmatprep.subr.bf16.mxu0 %v2792_v1 }
 0x6ef   :  { %v1006_v57 = vpop.f32.mrb[30].mxu1 }
 0x6f0   :  { %v2558_v58 = vpop.f32.mrb[31].mxu1  ;;  %2564 = vmatmul.mubr.msk.bf16.vlgmr.msra.gmra.mrb[32].mxu0 %vm88_vm1, %v2917_v7 }
 0x6f1   :  { %2579 = vmatprep.mubr.msk.bf16.mxu0 %vm2793_vm0, %v2792_v1  ;;  %2576 = vmatpush3.bf16.msra.mxu0 %v2708_v23 }
 0x6f2   :  { %2577 = vmatprep.subr.bf16.mxu0 %v2792_v1 }
 0x6f5   :  { %v1136_v60 = vpop.f32.mrb[32].mxu1  ;;  %2578 = vmatpush3.bf16.msra.mxu0 %v2709_v24  ;;  %v2711_v24 = vld [vmem:[%s3326_s4 + $0x38] sm:$0xff]  }
 0x6f6   :  { %v1137_v61 = vadd.f32 %v2300_v59, %v1136_v60  ;;  %v2573_v62 = vpop.f32.mrb[33].mxu1  ;;  %2589 = vmatprep.subr.bf16.mxu0 %v2792_v1 }
 0x6f7   :  { %v1139_v63 = vpop.f32.mrb[34].mxu1 }
 0x6f8   :  { %v1140_v0 = vadd.f32 %v2300_v59, %v1139_v63  ;;  %v2574_v2 = vpop.f32.mrb[35].mxu1  ;;  %2580 = vmatmul.mubr.msk.bf16.vlgmr.msra.gmra.mrb[36].mxu0 %vm88_vm1, %v2917_v7 }
 0x6f9   :  { %2591 = vmatprep.mubr.msk.bf16.mxu0 %vm2793_vm0, %v2792_v1 }
 0x6fa   :  { %v1143_v3 = vpack.c.bf16 %v1140_v0, %v1137_v61 }
 0x6fc   :  { %v1215_v4 = vsel %vm264_vm2, %v1143_v3, 0  ;;  %v1320_v16 = vrot.slane %v1143_v3, 4 }
 0x6fd   :  { %2584 = vmatpush3.bf16.xpose.msra.mxu1 %v1215_v4 }
 0x6fe   :  { %2595 = vmatprep.subr.bf16.mxu1 %v2792_v1  ;;  %v1325_v21 = vsel %vm264_vm2, %v1320_v16, 0 }
 0x7bb   :  { %v956_v5 = vpop.f32.mrb[28].mxu0 }
 0x7bc   :  { %v3109_v6 = vadd.f32 %v1003_v55, %v956_v5  ;;  %v2551_v8 = vpop.f32.mrb[29].mxu0 }
 0x7bd   :  { %v959_v9 = vpop.f32.mrb[30].mxu0 }
 0x7be   :  { %v3111_v10 = vadd.f32 %v1006_v57, %v959_v9  ;;  %v2552_v11 = vpop.f32.mrb[31].mxu0  ;;  %v2317_v9 = vld [vmem:[%s3330_s8 + $0x8] sm:$0xf] }
 0x7bf   :  { %v1436_v11 = vsel %vm332_vm3, %v2317_v9, 0 }
 0x7c3   :  { %v1069_v13 = vpop.f32.mrb[32].mxu0 }
 0x7c4   :  { %v2565_v14 = vpop.f32.mrb[33].mxu0  ;;  %v1070_v17 = vadd.f32 %v2291_v12, %v1069_v13  ;;  %v2713_v13 = vld [vmem:[%s3346_s1 + $0x38] sm:$0xff]  }
 0x7c5   :  { %v1072_v15 = vpop.f32.mrb[34].mxu0 }
 0x7c6   :  { %v1073_v18 = vadd.f32 %v2291_v12, %v1072_v15  ;;  %v2566_v19 = vpop.f32.mrb[35].mxu0  ;;  %v2712_v12 = vld [vmem:[%s3346_s1 + $0x30] sm:$0xff]  }
 0x7c7   :  { %v2710_v19 = vld [vmem:[%s3326_s4 + $0x30] sm:$0xff]  }
 0x7c8   :  { %v1076_v20 = vpack.c.bf16 %v1073_v18, %v1070_v17 }
 0x7ca   :  { %2586 = vmatmul.mubr.msk.bf16.vlgmr.msra.gmra.mrb[36].mxu1 %vm264_vm2, %v1076_v20  ;;  %v1318_v22 = vrot.slane %v1076_v20, 4 }
 0x7cb   :  { %2596 = vmatpush3.bf16.xpose.msra.mxu1 %v1325_v21  ;;  %2597 = vmatprep.mubr.msk.bf16.mxu1 %vm2793_vm0, %v2792_v1  ;;  %v1203_v44 = vpop.f32.mrb[36].mxu0 }
 0x7cc   :  { %2607 = vmatprep.subr.bf16.mxu1 %v2792_v1  ;;  %v2581_v30 = vpop.f32.mrb[37].mxu0  ;;  %v1204_v54 = vadd.f32 %v2309_v53, %v1203_v44  ;;  %v2333_v44 = vld [vmem:[%s3327_s5 + $0x3] ss:$0 sm:$0xff] }
 0x7cd   :  { %v1206_v55 = vpop.f32.mrb[38].mxu0 }
 0x7ce   :  { %v2582_v56 = vpop.f32.mrb[39].mxu0  ;;  %v1207_v57 = vadd.f32 %v2309_v53, %v1206_v55 }
 0x7d0   :  { %v1210_v58 = vpack.c.bf16 %v1207_v57, %v1204_v54 }
 0x7d2   :  { %2598 = vmatmul.mubr.msk.bf16.vlgmr.msra.gmra.mrb[40].mxu1 %vm264_vm2, %v1318_v22  ;;  %v1275_v59 = vsel %vm332_vm3, %v1210_v58, 0  ;;  %v1382_v0 = vrot.slane %v1210_v58, 4 }
 0x7d3   :  { %2609 = vmatprep.mubr.msk.bf16.mxu1 %vm2793_vm0, %v2792_v1  ;;  %2590 = vmatpush3.bf16.msra.mxu0 %v1275_v59 }
 0x7d4   :  { %2601 = vmatprep.subr.bf16.mxu0 %v2792_v1  ;;  %v1387_v3 = vsel %vm332_vm3, %v1382_v0, 0  ;;  %2608 = vmatpush3.bf16.msra.mxu1 %v1436_v11 }
 0x7d5   :  { %2621 = vmatprep.subr.bf16.mxu1 %v2792_v1 }
 0x89d   :  { %v1251_v25 = vpop.f32.mrb[36].mxu1 }
 0x89e   :  { %v1257_v26 = vmul.f32 0.35355338, %v1251_v25  ;;  %v2587_v27 = vpop.f32.mrb[37].mxu1 }
 0x89f   :  { %v1254_v28 = vpop.f32.mrb[38].mxu1 }
 0x8a0   :  { %v2588_v29 = vpop.f32.mrb[39].mxu1  ;;  %v1258_v31 = vadd.f32 %v1257_v26, %v2961_v34  ;;  %v2324_v26 = vld [vmem:[%s3325_s3 + $0x3] ss:$0 sm:$0xff] }
 0x8a2   :  { %v1259_v32 = vsel %vm264_vm2, %v1258_v31, -inf }
 0x8a3   :  { %1260 = vmax.xlane.f32.xlu0 %v1259_v32 }
 0x8a5   :  { %v1361_v33 = vpop.f32.mrb[40].mxu1 }
 0x8a6   :  { %v1367_v37 = vmul.f32 0.35355338, %v1361_v33  ;;  %v2599_v38 = vpop.f32.mrb[41].mxu1 }
 0x8a7   :  { %v1364_v39 = vpop.f32.mrb[42].mxu1 }
 0x8a8   :  { %v2600_v40 = vpop.f32.mrb[43].mxu1  ;;  %v1368_v41 = vadd.f32 %v1367_v37, %v2965_v43 }
 0x8aa   :  { %v1369_v42 = vsel %vm264_vm2, %v1368_v41, -inf }
 0x8ab   :  { %1370 = vmax.xlane.f32.xlu1 %v1369_v42 }
 0x930   :  { %v1261_v35 = vpop.xlane.xlu0 %1260 }
 0x931   :  { %v1262_v36 = vsub.f32 %v1258_v31, %v1261_v35 }
 0x933   :  { %v1263_v45 = vmul.f32 1.442695, %v1262_v36 }
 0x935   :  { %2738 = vpow2.f32 %v1263_v45 }
 0x938   :  { %v1371_v46 = vpop.xlane.xlu1 %1370 }
 0x939   :  { %v1372_v47 = vsub.f32 %v1368_v41, %v1371_v46 }
 0x93b   :  { %v1373_v48 = vmul.f32 1.442695, %v1372_v47 }
 0x93d   :  { %2740 = vpow2.f32 %v1373_v48 }
 0x93f   :  { %v2739_v49 = vpop.eup %2738 }
 0x940   :  { %v1265_v50 = vsel %vm264_vm2, %v2739_v49, 0.0 }
 0x941   :  { %1266 = vadd.xlane.f32.xlu0 %v1265_v50 }
 0x947   :  { %v2741_v51 = vpop.eup %2740 }
 0x948   :  { %v1375_v52 = vsel %vm264_vm2, %v2741_v51, 0.0 }
 0x949   :  { %1376 = vadd.xlane.f32.xlu1 %v1375_v52  ;;  %v2715_v52 = vld [vmem:[%s3328_s6 + $0x38] sm:$0xff]  }
 0x9ce   :  { %v1267_v60 = vpop.xlane.xlu0 %1266 }
 0x9cf   :  { %2742 = vrcp.f32 %v1267_v60 }
 0x9d6   :  { %v1377_v61 = vpop.xlane.xlu1 %1376 }
 0x9d7   :  { %2744 = vrcp.f32 %v1377_v61 }
 0x9d9   :  { %v2743_v62 = vpop.eup %2742 }
 0x9da   :  { %v1269_v63 = vmul.f32 %v2743_v62, %v2739_v49 }
 0x9dc   :  { %v1270_v2 = vpack.c.bf16 %v1269_v63, %v1269_v63 }
 0x9de   :  { %2592 = vmatmul.mubr.msk.bf16.vlgmr.msra.gmra.mrb[40].mxu0 %vm264_vm2, %v1270_v2 }
 0x9df   :  { %2602 = vmatpush3.bf16.msra.mxu0 %v1387_v3  ;;  %2603 = vmatprep.mubr.msk.bf16.mxu0 %vm2793_vm0, %v2792_v1 }
 0x9e0   :  { %2613 = vmatprep.subr.bf16.mxu0 %v2792_v1 }
 0x9e1   :  { %v2745_v4 = vpop.eup %2744 }
 0x9e2   :  { %v1379_v5 = vmul.f32 %v2745_v4, %v2741_v51  ;;  %v2714_v51 = vld [vmem:[%s3328_s6 + $0x30] sm:$0xff]  }
 0x9e4   :  { %v1380_v8 = vpack.c.bf16 %v1379_v5, %v1379_v5 }
 0x9e6   :  { %2604 = vmatmul.mubr.msk.bf16.vlgmr.msra.gmra.mrb[44].mxu0 %vm264_vm2, %v1380_v8 }
 0x9e7   :  { %2617 = vmatprep.mubr.msk.bf16.mxu0 %vm2793_vm0, %v2792_v1  ;;  %2614 = vmatpush3.bf16.msra.mxu0 %v2712_v12 }
 0x9e8   :  { %2615 = vmatprep.subr.bf16.mxu0 %v2792_v1 }
 0x9eb   :  { %2616 = vmatpush3.bf16.msra.mxu0 %v2713_v13 }
 0x9ec   :  { %2629 = vmatprep.subr.bf16.mxu0 %v2792_v1 }
 0x9ee   :  { %2618 = vmatmul.mubr.msk.bf16.vlgmr.msra.gmra.mrb[48].mxu0 %vm88_vm1, %v2917_v7 }
 0x9ef   :  { %2633 = vmatprep.mubr.msk.bf16.mxu0 %vm2793_vm0, %v2792_v1  ;;  %2630 = vmatpush3.bf16.msra.mxu0 %v2714_v51 }
 0x9f0   :  { %2631 = vmatprep.subr.bf16.mxu0 %v2792_v1 }
 0x9f3   :  { %2632 = vmatpush3.bf16.msra.mxu0 %v2715_v52 }
 0x9f4   :  { %2643 = vmatprep.subr.bf16.mxu0 %v2792_v1 }
 0x9f6   :  { %2634 = vmatmul.mubr.msk.bf16.vlgmr.msra.gmra.mrb[52].mxu0 %vm88_vm1, %v2917_v7 }
 0x9f7   :  { %2645 = vmatprep.mubr.msk.bf16.mxu0 %vm2793_vm0, %v2792_v1 }
 0xab1   :  { %v1311_v14 = vpop.f32.mrb[40].mxu0 }
 0xab2   :  { %v2593_v15 = vpop.f32.mrb[41].mxu0 }
 0xab3   :  { %v1314_v16 = vpop.f32.mrb[42].mxu0 }
 0xab4   :  { %v2594_v17 = vpop.f32.mrb[43].mxu0  ;;  %v2342_v16 = vld [vmem:[%s3329_s7 + $0x3] ss:$0 sm:$0xff] }
 0xab9   :  { %v1423_v18 = vpop.f32.mrb[44].mxu0 }
 0xaba   :  { %v1429_v20 = vpack.c.bf16 %v1423_v18, %v1311_v14  ;;  %v2605_v21 = vpop.f32.mrb[45].mxu0 }
 0xabb   :  { %v1426_v22 = vpop.f32.mrb[46].mxu0 }
 0xabc   :  { %v2606_v23 = vpop.f32.mrb[47].mxu0  ;;  %2610 = vmatmul.mubr.msk.bf16.vlgmr.msra.gmra.mrb[44].mxu1 %vm264_vm2, %v1429_v20 }
 0xabd   :  { %2622 = vmatpush3.bf16.msra.mxu1 %v2710_v19  ;;  %2625 = vmatprep.mubr.msk.bf16.mxu1 %vm2793_vm0, %v2792_v1 }
 0xabe   :  { %2623 = vmatprep.subr.bf16.mxu1 %v2792_v1 }
 0xac1   :  { %2624 = vmatpush3.bf16.msra.mxu1 %v2711_v24  ;;  %v1540_v25 = vpop.f32.mrb[48].mxu0 }
 0xac2   :  { %2637 = vmatprep.subr.bf16.mxu1 %v2792_v1  ;;  %v2619_v27 = vpop.f32.mrb[49].mxu0  ;;  %v1541_v28 = vadd.f32 %v2324_v26, %v1540_v25 }
 0xac3   :  { %v1543_v29 = vpop.f32.mrb[50].mxu0 }
 0xac4   :  { %2626 = vmatmul.mubr.msk.bf16.vlgmr.msra.gmra.mrb[48].mxu1 %vm88_vm1, %v2917_v7  ;;  %v1544_v31 = vadd.f32 %v2324_v26, %v1543_v29  ;;  %v2620_v32 = vpop.f32.mrb[51].mxu0 }
 0xac5   :  { %2639 = vmatprep.mubr.msk.bf16.mxu1 %vm2793_vm0, %v2792_v1 }
 0xac6   :  { %v1547_v33 = vpack.c.bf16 %v1544_v31, %v1541_v28 }
 0xac8   :  { %v1789_v50 = vrot.slane %v1547_v33, 4 }
 0xac9   :  { %v1674_v3 = vpop.f32.mrb[52].mxu0 }
 0xaca   :  { %v2635_v4 = vpop.f32.mrb[53].mxu0  ;;  %v1675_v17 = vadd.f32 %v2342_v16, %v1674_v3 }
 0xacb   :  { %v1677_v18 = vpop.f32.mrb[54].mxu0 }
 0xacc   :  { %v2636_v19 = vpop.f32.mrb[55].mxu0  ;;  %v1678_v20 = vadd.f32 %v2342_v16, %v1677_v18 }
 0xace   :  { %v1681_v21 = vpack.c.bf16 %v1678_v20, %v1675_v17  ;;  %v2354_v20 = vld [vmem:[%s3333_s11] ss:$0 sm:$0xff] }
 0xad0   :  { %v1746_v22 = vsel %vm332_vm3, %v1681_v21, 0  ;;  %v1853_v27 = vrot.slane %v1681_v21, 4 }
 0xad1   :  { %2644 = vmatpush3.bf16.msra.mxu0 %v1746_v22 }
 0xad2   :  { %2655 = vmatprep.subr.bf16.mxu0 %v2792_v1  ;;  %v1858_v29 = vsel %vm332_vm3, %v1853_v27, 0  ;;  %v2720_v27 = vld [vmem:[%s3336_s14 + $0x10] sm:$0xff]  }
 0xb8f   :  { %v1472_v37 = vpop.f32.mrb[44].mxu1 }
 0xb90   :  { %v3191_v38 = vadd.f32 %v1472_v37, %v3109_v6  ;;  %v2611_v39 = vpop.f32.mrb[45].mxu1  ;;  %v2350_v37 = vld [vmem:[%s3330_s8 + $0xc] sm:$0xf] }
 0xb91   :  { %v1475_v40 = vpop.f32.mrb[46].mxu1  ;;  %v1907_v39 = vsel %vm332_vm3, %v2350_v37, 0 }
 0xb92   :  { %v3194_v41 = vadd.f32 %v1475_v40, %v3111_v10  ;;  %v2612_v42 = vpop.f32.mrb[47].mxu1 }
 0xb97   :  { %v1607_v30 = vpop.f32.mrb[48].mxu1 }
 0xb98   :  { %v2627_v35 = vpop.f32.mrb[49].mxu1  ;;  %v1608_v45 = vadd.f32 %v2333_v44, %v1607_v30 }
 0xb99   :  { %v1610_v36 = vpop.f32.mrb[50].mxu1 }
 0xb9a   :  { %v1611_v46 = vadd.f32 %v2333_v44, %v1610_v36  ;;  %v2628_v47 = vpop.f32.mrb[51].mxu1 }
 0xb9c   :  { %v1614_v48 = vpack.c.bf16 %v1611_v46, %v1608_v45 }
 0xb9e   :  { %v1686_v6 = vsel %vm264_vm2, %v1614_v48, 0  ;;  %v1791_v49 = vrot.slane %v1614_v48, 4 }
 0xb9f   :  { %2638 = vmatpush3.bf16.xpose.msra.mxu1 %v1686_v6  ;;  %v2352_v6 = vld [vmem:[%s3331_s9] ss:$0 sm:$0xff] }
 0xba0   :  { %2649 = vmatprep.subr.bf16.mxu1 %v2792_v1  ;;  %v1796_v10 = vsel %vm264_vm2, %v1791_v49, 0 }
 0xba6   :  { %2640 = vmatmul.mubr.msk.bf16.vlgmr.msra.gmra.mrb[52].mxu1 %vm264_vm2, %v1547_v33 }
 0xba7   :  { %2650 = vmatpush3.bf16.xpose.msra.mxu1 %v1796_v10  ;;  %2651 = vmatprep.mubr.msk.bf16.mxu1 %vm2793_vm0, %v2792_v1 }
 0xba8   :  { %2661 = vmatprep.subr.bf16.mxu1 %v2792_v1 }
 0xbae   :  { %2652 = vmatmul.mubr.msk.bf16.vlgmr.msra.gmra.mrb[56].mxu1 %vm264_vm2, %v1789_v50 }
 0xbaf   :  { %2663 = vmatprep.mubr.msk.bf16.mxu1 %vm2793_vm0, %v2792_v1  ;;  %2662 = vmatpush3.bf16.msra.mxu1 %v1907_v39 }
 0xbb0   :  { %2675 = vmatprep.subr.bf16.mxu1 %v2792_v1 }
 0xc79   :  { %v1722_v53 = vpop.f32.mrb[52].mxu1 }
 0xc7a   :  { %v1728_v54 = vmul.f32 0.35355338, %v1722_v53  ;;  %v2641_v55 = vpop.f32.mrb[53].mxu1 }
 0xc7b   :  { %v1725_v56 = vpop.f32.mrb[54].mxu1  ;;  %v2766_v55 = vld [vmem:[%s3347_s22] sm:$0xff] }
 0xc7c   :  { %v2642_v57 = vpop.f32.mrb[55].mxu1  ;;  %v1729_v58 = vadd.f32 %v1728_v54, %v2961_v34 }
 0xc7e   :  { %v1730_v59 = vsel %vm264_vm2, %v1729_v58, -inf }
 0xc7f   :  { %1731 = vmax.xlane.f32.xlu0 %v1730_v59 }
 0xc81   :  { %v1832_v60 = vpop.f32.mrb[56].mxu1 }
 0xc82   :  { %v1838_v61 = vmul.f32 0.35355338, %v1832_v60  ;;  %v2653_v62 = vpop.f32.mrb[57].mxu1 }
 0xc83   :  { %v1835_v63 = vpop.f32.mrb[58].mxu1 }
 0xc84   :  { %v2654_v0 = vpop.f32.mrb[59].mxu1  ;;  %v1839_v7 = vadd.f32 %v1838_v61, %v2965_v43 }
 0xc86   :  { %v1840_v2 = vsel %vm264_vm2, %v1839_v7, -inf }
 0xc87   :  { %1841 = vmax.xlane.f32.xlu1 %v1840_v2 }
 0xd0c   :  { %v1732_v5 = vpop.xlane.xlu0 %1731 }
 0xd0d   :  { %v1733_v8 = vsub.f32 %v1729_v58, %v1732_v5  ;;  %v2767_v58 = vld [vmem:[%s3347_s22 + $0x8] sm:$0xff]  ;;  %v2716_v5 = vld [vmem:[%s3334_s12] sm:$0xff]  }
 0xd0f   :  { %v1734_v9 = vmul.f32 1.442695, %v1733_v8  ;;  %v2717_v8 = vld [vmem:[%s3334_s12 + $0x8] sm:$0xff]  }
 0xd11   :  { %2746 = vpow2.f32 %v1734_v9 }
 0xd14   :  { %v1842_v34 = vpop.xlane.xlu1 %1841 }
 0xd15   :  { %v1843_v11 = vsub.f32 %v1839_v7, %v1842_v34 }
 0xd17   :  { %v1844_v12 = vmul.f32 1.442695, %v1843_v11 }
 0xd19   :  { %2748 = vpow2.f32 %v1844_v12 }
 0xd1b   :  { %v2747_v13 = vpop.eup %2746 }
 0xd1c   :  { %v1736_v14 = vsel %vm264_vm2, %v2747_v13, 0.0 }
 0xd1d   :  { %1737 = vadd.xlane.f32.xlu0 %v1736_v14 }
 0xd23   :  { %v2749_v15 = vpop.eup %2748 }
 0xd24   :  { %v1846_v43 = vsel %vm264_vm2, %v2749_v15, 0.0 }
 0xd25   :  { %1847 = vadd.xlane.f32.xlu1 %v1846_v43  ;;  %v2353_v43 = vld [vmem:[%s3332_s10] ss:$0 sm:$0xff] }
 0xdaa   :  { %v1738_v23 = vpop.xlane.xlu0 %1737 }
 0xdab   :  { %2750 = vrcp.f32 %v1738_v23 }
 0xdb2   :  { %v1848_v24 = vpop.xlane.xlu1 %1847 }
 0xdb3   :  { %2752 = vrcp.f32 %v1848_v24 }
 0xdb5   :  { %v2751_v25 = vpop.eup %2750 }
 0xdb6   :  { %v1740_v26 = vmul.f32 %v2751_v25, %v2747_v13  ;;  %v2718_v25 = vld [vmem:[%s3336_s14] sm:$0xff]  }
 0xdb8   :  { %v1741_v28 = vpack.c.bf16 %v1740_v26, %v1740_v26  ;;  %v2719_v26 = vld [vmem:[%s3336_s14 + $0x8] sm:$0xff]  }
 0xdba   :  { %2646 = vmatmul.mubr.msk.bf16.vlgmr.msra.gmra.mrb[56].mxu0 %vm264_vm2, %v1741_v28  ;;  %v2721_v28 = vld [vmem:[%s3336_s14 + $0x18] sm:$0xff]  }
 0xdbb   :  { %2656 = vmatpush3.bf16.msra.mxu0 %v1858_v29  ;;  %2657 = vmatprep.mubr.msk.bf16.mxu0 %vm2793_vm0, %v2792_v1  ;;  %v2355_v29 = vld [vmem:[%s3335_s13] ss:$0 sm:$0xff] }
 0xdbc   :  { %2667 = vmatprep.subr.bf16.mxu0 %v2792_v1 }
 0xdbd   :  { %v2753_v31 = vpop.eup %2752 }
 0xdbe   :  { %v1850_v32 = vmul.f32 %v2753_v31, %v2749_v15 }
 0xdc0   :  { %v1851_v33 = vpack.c.bf16 %v1850_v32, %v1850_v32 }
 0xdc2   :  { %2658 = vmatmul.mubr.msk.bf16.vlgmr.msra.gmra.mrb[60].mxu0 %vm264_vm2, %v1851_v33 }
 0xdc3   :  { %2671 = vmatprep.mubr.msk.bf16.mxu0 %vm2793_vm0, %v2792_v1  ;;  %2668 = vmatpush3.bf16.msra.mxu0 %v2716_v5 }
 0xdc4   :  { %2669 = vmatprep.subr.bf16.mxu0 %v2792_v1 }
 0xdc7   :  { %2670 = vmatpush3.bf16.msra.mxu0 %v2717_v8 }
 0xe8d   :  { %v1782_v40 = vpop.f32.mrb[56].mxu0 }
 0xe8e   :  { %v2647_v42 = vpop.f32.mrb[57].mxu0 }
 0xe8f   :  { %v1785_v44 = vpop.f32.mrb[58].mxu0 }
 0xe90   :  { %v2648_v30 = vpop.f32.mrb[59].mxu0 }
 0xe95   :  { %v1894_v35 = vpop.f32.mrb[60].mxu0 }
 0xe96   :  { %v1900_v36 = vpack.c.bf16 %v1894_v35, %v1782_v40  ;;  %v2659_v45 = vpop.f32.mrb[61].mxu0 }
 0xe97   :  { %v1897_v46 = vpop.f32.mrb[62].mxu0 }
 0xe98   :  { %v2660_v47 = vpop.f32.mrb[63].mxu0  ;;  %2664 = vmatmul.mubr.msk.bf16.vlgmr.msra.gmra.mrb[60].mxu1 %vm264_vm2, %v1900_v36 }
 0xe99   :  { %2683 = vmatprep.mubr.msk.bf16.mxu1 %vm2793_vm0, %v2792_v1  ;;  %2676 = vmatpush3.bf16.msra.mxu1 %v2718_v25 }
 0xe9a   :  { %2677 = vmatprep.subr.bf16.mxu1 %v2792_v1 }
 0xe9d   :  { %2678 = vmatpush3.bf16.msra.mxu1 %v2719_v26 }
 0xe9e   :  { %2679 = vmatprep.subr.bf16.mxu1 %v2792_v1 }
 0xea1   :  { %2680 = vmatpush3.bf16.msra.mxu1 %v2720_v27 }
 0xea2   :  { %2681 = vmatprep.subr.bf16.mxu1 %v2792_v1 }
 0xea5   :  { %2682 = vmatpush3.bf16.msra.mxu1 %v2721_v28 }
 0xf6b   :  { %v1943_v48 = vpop.f32.mrb[60].mxu1 }
 0xf6c   :  { %v1950_v49 = vadd.f32 %v1943_v48, %v3191_v38  ;;  %v2665_v10 = vpop.f32.mrb[61].mxu1 }
 0xf6d   :  { %v1946_v50 = vpop.f32.mrb[62].mxu1 }
 0xf6e   :  { %v1959_v51 = vadd.f32 %v2352_v6, %v1950_v49  ;;  %v1951_v52 = vadd.f32 %v1946_v50, %v3194_v41  ;;  %v2666_v53 = vpop.f32.mrb[63].mxu1  ;;  %v2359_v49 = vld [vmem:[%s3337_s15] ss:$0 sm:$0xff] }
 0xf70   :  { %v1960_v54 = vadd.f32 %v2352_v6, %v1951_v52  ;;  %v1961_v56 = vadd.f32 %v2766_v55, %v1959_v51 }
 0xf72   :  { %v1965_v57 = vsel %vm88_vm1, %v1961_v56, 0.0  ;;  %v1962_v59 = vadd.f32 %v2767_v58, %v1960_v54 }
 0xf73   :  { %1966 = vadd.xlane.f32.xlu0 %v1965_v57 }
 0xf74   :  { %v1968_v38 = vsel %vm88_vm1, %v1962_v59, 0.0 }
 0xf75   :  { %1969 = vadd.xlane.f32.xlu1 %v1968_v38 }
0x1000   :  { %v1967_v60 = vpop.xlane.xlu0 %1966 }
0x1001   :  { %v1972_v41 = vmul.f32 0.03125, %v1967_v60 }
0x1002   :  { %v1970_v61 = vpop.xlane.xlu1 %1969 }
0x1003   :  { %v1974_v62 = vsub.f32 %v1961_v56, %v1972_v41  ;;  %v1973_v63 = vmul.f32 0.03125, %v1970_v61 }
0x1005   :  { %v1975_v0 = vsub.f32 %v1962_v59, %v1973_v63  ;;  %v1976_v7 = vmul.f32 %v1974_v62, %v1974_v62 }
0x1007   :  { %v1978_v2 = vsel %vm88_vm1, %v1976_v7, 0.0  ;;  %v1977_v3 = vmul.f32 %v1975_v0, %v1975_v0 }
0x1008   :  { %1979 = vadd.xlane.f32.xlu0 %v1978_v2 }
0x1009   :  { %v1981_v4 = vsel %vm88_vm1, %v1977_v3, 0.0 }
0x100a   :  { %1982 = vadd.xlane.f32.xlu1 %v1981_v4 }
0x1095   :  { %v1980_v9 = vpop.xlane.xlu0 %1979 }
0x1096   :  { %v1984_v34 = vmul.f32 0.03125, %v1980_v9 }
0x1097   :  { %v1983_v11 = vpop.xlane.xlu1 %1982 }
0x1098   :  { %v1986_v12 = vadd.f32 1e-12, %v1984_v34  ;;  %v1985_v13 = vmul.f32 0.03125, %v1983_v11 }
0x109a   :  { %2754 = vrsqrt.f32 %v1986_v12  ;;  %v1987_v14 = vadd.f32 1e-12, %v1985_v13  ;;  %v2365_v12 = vld [vmem:[%s3338_s16] ss:$0 sm:$0xff] }
0x109c   :  { %2756 = vrsqrt.f32 %v1987_v14 }
0x10a4   :  { %v2755_v15 = vpop.eup %2754 }
0x10a5   :  { %v1990_v16 = vmul.f32 %v2755_v15, %v1974_v62  ;;  %v2366_v15 = vld [vmem:[%s3339_s17] ss:$0 sm:$0xff] }
0x10a6   :  { %v2757_v17 = vpop.eup %2756 }
0x10a7   :  { %v1998_v18 = vmul.f32 %v2353_v43, %v1990_v16  ;;  %v1991_v19 = vmul.f32 %v2757_v17, %v1975_v0 }
0x10a9   :  { %v1999_v21 = vmul.f32 %v2353_v43, %v1991_v19  ;;  %v2006_v22 = vadd.f32 %v2354_v20, %v1998_v18 }
0x10ab   :  { %v2007_v23 = vadd.f32 %v2354_v20, %v1999_v21 }
0x10ad   :  { %v2008_v24 = vpack.c.bf16 %v2007_v23, %v2006_v22 }
0x10af   :  { %2672 = vmatmul.mubr.msk.bf16.vlgmr.msra.gmra.mrb[64].mxu0 %vm88_vm1, %v2008_v24 }
0x1182   :  { %v2069_v31 = vpop.f32.mrb[64].mxu0 }
0x1183   :  { %v2070_v32 = vadd.f32 %v2355_v29, %v2069_v31  ;;  %v2673_v33 = vpop.f32.mrb[65].mxu0 }
0x1184   :  { %v2072_v37 = vpop.f32.mrb[66].mxu0 }
0x1185   :  { %v2079_v39 = vmul.f32 0.70710677, %v2070_v32  ;;  %v2073_v40 = vadd.f32 %v2355_v29, %v2072_v37  ;;  %v2674_v42 = vpop.f32.mrb[67].mxu0  ;;  %v2076_v36 = vmul.f32 0.5, %v2070_v32 }
0x1187   :  { %2758 = verf.f32 %v2079_v39  ;;  %v2080_v44 = vmul.f32 0.70710677, %v2073_v40  ;;  %v2077_v45 = vmul.f32 0.5, %v2073_v40 }
0x1189   :  { %2760 = verf.f32 %v2080_v44 }
0x1191   :  { %v2759_v1 = vpop.eup %2758 }
0x1192   :  { %v2083_v30 = vadd.f32 1.0, %v2759_v1 }
0x1193   :  { %v2761_v35 = vpop.eup %2760 }
0x1194   :  { %v2084_v46 = vadd.f32 1.0, %v2761_v35  ;;  %v2085_v47 = vmul.f32 %v2083_v30, %v2076_v36 }
0x1196   :  { %v2086_v48 = vmul.f32 %v2084_v46, %v2077_v45 }
0x1198   :  { %v2087_v6 = vpack.c.bf16 %v2086_v48, %v2085_v47 }
0x119a   :  { %2684 = vmatmul.mubr.msk.bf16.vlgmr.msra.gmra.mrb[64].mxu1 %vm2127_vm4, %v2087_v6 }
0x126d   :  { %v2165_v10 = vpop.f32.mrb[64].mxu1 }
0x126e   :  { %v2166_v50 = vadd.f32 %v2359_v49, %v2165_v10  ;;  %v2685_v51 = vpop.f32.mrb[65].mxu1 }
0x126f   :  { %v2168_v52 = vpop.f32.mrb[66].mxu1 }
0x1270   :  { %v2169_v53 = vadd.f32 %v2359_v49, %v2168_v52  ;;  %v2686_v54 = vpop.f32.mrb[67].mxu1  ;;  %v2172_v55 = vadd.f32 %v2166_v50, %v2006_v22 }
0x1272   :  { %v2176_v56 = vsel %vm88_vm1, %v2172_v55, 0.0  ;;  %v2173_v57 = vadd.f32 %v2169_v53, %v2007_v23 }
0x1273   :  { %2177 = vadd.xlane.f32.xlu0 %v2176_v56 }
0x1274   :  { %v2179_v58 = vsel %vm88_vm1, %v2173_v57, 0.0 }
0x1275   :  { %2180 = vadd.xlane.f32.xlu1 %v2179_v58 }
0x1300   :  { %v2178_v59 = vpop.xlane.xlu0 %2177 }
0x1301   :  { %v2182_v38 = vmul.f32 0.03125, %v2178_v59 }
0x1302   :  { %v2181_v60 = vpop.xlane.xlu1 %2180 }
0x1303   :  { %v2184_v41 = vsub.f32 %v2172_v55, %v2182_v38  ;;  %v2183_v61 = vmul.f32 0.03125, %v2181_v60 }
0x1305   :  { %v2185_v62 = vsub.f32 %v2173_v57, %v2183_v61  ;;  %v2186_v63 = vmul.f32 %v2184_v41, %v2184_v41 }
0x1307   :  { %v2188_v0 = vsel %vm88_vm1, %v2186_v63, 0.0  ;;  %v2187_v7 = vmul.f32 %v2185_v62, %v2185_v62 }
0x1308   :  { %2189 = vadd.xlane.f32.xlu0 %v2188_v0 }
0x1309   :  { %v2191_v2 = vsel %vm88_vm1, %v2187_v7, 0.0 }
0x130a   :  { %2192 = vadd.xlane.f32.xlu1 %v2191_v2 }
0x1395   :  { %v2190_v3 = vpop.xlane.xlu0 %2189 }
0x1396   :  { %v2194_v4 = vmul.f32 0.03125, %v2190_v3 }
0x1397   :  { %v2193_v5 = vpop.xlane.xlu1 %2192 }
0x1398   :  { %v2196_v8 = vadd.f32 1e-12, %v2194_v4  ;;  %v2195_v9 = vmul.f32 0.03125, %v2193_v5 }
0x139a   :  { %2762 = vrsqrt.f32 %v2196_v8  ;;  %v2197_v34 = vadd.f32 1e-12, %v2195_v9 }
0x139c   :  { %2764 = vrsqrt.f32 %v2197_v34 }
0x13a4   :  { %v2763_v11 = vpop.eup %2762 }
0x13a5   :  { %v2200_v13 = vmul.f32 %v2763_v11, %v2184_v41 }
0x13a6   :  { %v2765_v14 = vpop.eup %2764 }
0x13a7   :  { %v2201_v43 = vmul.f32 %v2765_v14, %v2185_v62  ;;  %v2208_v16 = vmul.f32 %v2365_v12, %v2200_v13 }
0x13a9   :  { %v2209_v17 = vmul.f32 %v2365_v12, %v2201_v43  ;;  %v2216_v18 = vadd.f32 %v2366_v15, %v2208_v16 }
0x13ab   :  { %v2217_v19 = vadd.f32 %v2366_v15, %v2209_v17  ;;  %2218 = vst.msk [vmem:[#allocation2] sm:$0xff] %vm88_vm1, %v2216_v18 }
0x13ad   :  { %2219 = vst.msk [vmem:[#allocation2 + $0x8] sm:$0xff] %vm88_vm1, %v2217_v19 }
0x13ae   :  { %2779 = shalt.err (!%p2776_p4)
}
0x13af   :  { %s2780_s21 = scalar_lea.hbm %s3340_s18, 256 }
0x13b0   :  { %p2781_p5 = scmp.ne.s32.totalorder %s3340_s18, %s2780_s21  ;;  %p2784_p6 = scmp.lt.u32.totalorder %s2780_s21, %s3340_s18 }
0x13b2   :  { %p2786_p7 = pnand %p2784_p6, %p2781_p5 }
0x13b4   :  { %2789 = shalt.err (!%p2786_p7)
}
0x13b5   :  { %s2795_s23 = smov 128   ;;  %s2796_s24 = smov 8  }
0x13b6   :  { %2231 = dma.vmem_to_hbm [thread:$0]  %s2226_s19, 256, %s3340_s18, [#allocation3], %s2795_s23, %s2795_s23, %s2796_s24  }
0x13b7   :  { %2790 = dma.done.wait [#allocation3], 256  }
0x13b8   :  { %2791 = vsyncadd [#allocation3], 4294967040 }
0x13b9   :  { %2235 = vsyncpa [#allocation3], 1 }

</bundles_post_ra>
